<compile_context>
chip_gen: v6e
topology: v6e:2x2x1
jax: 0.10.0
libtpu: 0.0.40
codegen_flags: <defaults>
</compile_context>

<pallas_src>
import functools

import jax
import jax.numpy as jnp
from jax.experimental import pallas as pl
from jax.experimental.pallas import tpu as pltpu

EPS = 1e-12  # F.normalize default eps


def _netvlad_kernel(x_ref, w_ref, cent_ref, o_ref, *, block_n):
    """One block of `block_n` samples per grid step.

    x_ref:    (Bn, C, S)  raw (un-normalised) descriptors, channels-first
    w_ref:    (K, C)      1x1-conv weight (squeezed)
    cent_ref: (K, C)      cluster centroids
    o_ref:    (Bn, K, C)  fully normalised VLAD descriptors
    """
    w = w_ref[...]        # (K, C) -- hoisted, reused across samples
    cent = cent_ref[...]  # (K, C)

    for b in range(block_n):  # static unroll; block_n is small (<= 8)
        xb = x_ref[b]  # (C, S)

        # --- descriptor-wise L2 norm over C (F.normalize dim=1), kept as a
        #     per-location scale row; the (C,S) block itself is never rescaled.
        ssq = jnp.sum(xb * xb, axis=0, keepdims=True)          # (1, S)
        inv_n = jax.lax.rsqrt(jnp.maximum(ssq, EPS * EPS))     # (1, S) == 1/max(||x_s||, eps)

        # --- 1x1 conv == (K,C)@(C,S) matmul; fold the L2 norm into the logits.
        logits = jnp.dot(w, xb, preferred_element_type=jnp.float32) * inv_n  # (K, S)

        # --- softmax over clusters (axis 0 here == PyTorch dim=1)
        m = jnp.max(logits, axis=0, keepdims=True)             # (1, S)
        e = jnp.exp(logits - m)                                # (K, S)
        a = e * (1.0 / jnp.sum(e, axis=0, keepdims=True))      # (K, S)

        asum = jnp.sum(a, axis=1, keepdims=True)               # (K, 1)
        a_n = a * inv_n                                        # (K, S): a[k,s]/||x_s||

        # --- VLAD aggregation:
        #     vlad[k,c] = sum_s a[k,s]*(xn[c,s]-cent[k,c])
        #               = (a_n . x^T)[k,c] - cent[k,c]*asum[k]
        #     dot_general contracts S of both operands (no transpose emitted).
        awx = jax.lax.dot_general(
            a_n, xb, (((1,), (1,)), ((), ())),
            preferred_element_type=jnp.float32)                # (K, C)
        vlad = awx - cent * asum                               # (K, C)

        # --- fused intra (over C) + global (over K*C) L2 normalisation:
        #     rsqrt on EUP, single multiply pass over the (K, C) tile.
        rsq = jnp.sum(vlad * vlad, axis=1, keepdims=True)      # (K, 1)
        inv_intra = jax.lax.rsqrt(jnp.maximum(rsq, EPS * EPS)) # (K, 1)
        gsq = jnp.sum(rsq * (inv_intra * inv_intra))           # ||intra-normed vlad||^2
        inv_glob = jax.lax.rsqrt(jnp.maximum(gsq, EPS * EPS))
        o_ref[b] = (vlad * (inv_intra * inv_glob)).astype(o_ref.dtype)


def _pick_block_n(n_batch, max_bn=8):
    """Largest Bn dividing N while keeping >= 2 grid steps (v7x has 2 TCs)."""
    for cand in (max_bn, 4, 2):
        if n_batch % cand == 0 and n_batch // cand >= 2:
            return cand
    return 1


def netvlad_forward(x_nchw, conv_weight, centroids, block_n=None):
    """x_nchw: (N, C, H, W); conv_weight: (K, C); centroids: (K, C)."""
    N, C, H, W = x_nchw.shape
    K = conv_weight.shape[0]
    S = H * W

    # Free reshape only -- no transpose, no extra HBM round trip.
    x_ncs = x_nchw.reshape(N, C, S)

    if block_n is None:
        block_n = _pick_block_n(N)
    assert N % block_n == 0, "batch must be divisible by block_n"

    kernel = functools.partial(_netvlad_kernel, block_n=block_n)

    vlad = pl.pallas_call(
        kernel,
        out_shape=jax.ShapeDtypeStruct((N, K, C), x_nchw.dtype),
        grid_spec=pltpu.PrefetchScalarGridSpec(
            num_scalar_prefetch=0,
            grid=(N // block_n,),
            in_specs=[
                pl.BlockSpec((block_n, C, S), lambda n: (n, 0, 0)),
                pl.BlockSpec((K, C), lambda n: (0, 0)),
                pl.BlockSpec((K, C), lambda n: (0, 0)),
            ],
            out_specs=pl.BlockSpec((block_n, K, C), lambda n: (n, 0, 0)),
        ),
        compiler_params=pltpu.CompilerParams(
            dimension_semantics=("parallel",)),
    )(x_ncs, conv_weight, centroids)

    return vlad.reshape(N, K * C)  # free reshape, lane-dense output


def netvlad_reference(x_nchw, conv_weight, centroids):
    """Pure-JAX reference mirroring the PyTorch forward (HIGHEST-precision dots)."""
    N, C, H, W = x_nchw.shape
    hp = jax.lax.Precision.HIGHEST
    nrm = jnp.sqrt(jnp.sum(x_nchw * x_nchw, axis=1, keepdims=True))
    xn = x_nchw / jnp.maximum(nrm, EPS)                                # (N, C, H, W)
    x_flat = xn.reshape(N, C, H * W)                                   # (N, C, S)
    logits = jnp.einsum('kc,ncs->nks', conv_weight, x_flat, precision=hp)
    a = jax.nn.softmax(logits, axis=1)                                 # softmax over K
    vlad = jnp.einsum('nks,ncs->nkc', a, x_flat, precision=hp) \
        - centroids[None] * jnp.sum(a, axis=-1)[:, :, None]            # (N, K, C)
    inorm = jnp.sqrt(jnp.sum(vlad * vlad, axis=2, keepdims=True))
    vlad = vlad / jnp.maximum(inorm, EPS)
    vlad = vlad.reshape(N, -1)
    gnorm = jnp.sqrt(jnp.sum(vlad * vlad, axis=1, keepdims=True))
    return vlad / jnp.maximum(gnorm, EPS)


if __name__ == "__main__":
    # Default module dims K=64, dim=128; small 4x4 spatial map, batch 4
    # (=> block_n=2 samples per grid step, grid of 2 parallel steps).
    N, C, H, W = 4, 128, 4, 4
    K = 64

    key = jax.random.PRNGKey(0)
    kx, kw, kc = jax.random.split(key, 3)

    x = jax.random.normal(kx, (N, C, H, W), dtype=jnp.float32)
    # nn.Conv2d default init ~ U(-1/sqrt(fan_in), 1/sqrt(fan_in)), fan_in = C;
    # weight stored squeezed as (K, C).
    bound = 1.0 / jnp.sqrt(jnp.float32(C))
    conv_weight = jax.random.uniform(kw, (K, C), dtype=jnp.float32,
                                     minval=-bound, maxval=bound)
    # centroids = torch.rand(K, C): U[0, 1)
    centroids = jax.random.uniform(kc, (K, C), dtype=jnp.float32)

    out = jax.block_until_ready(netvlad_forward(x, conv_weight, centroids))
    ref = netvlad_reference(x, conv_weight, centroids)

    assert out.shape == (N, K * C)
    # Kernel matmuls use native MXU precision (bf16 operand rounding, f32
    # accumulation) while the reference uses HIGHEST-precision einsums, so the
    # tolerance is sized for bf16 input rounding rather than 1e-4.
    assert jnp.allclose(out, ref, rtol=2e-3, atol=2e-3), "mismatch vs reference"

    print("KERNEL_OK")
</pallas_src>

<mosaic_0001>
module attributes {stable_mosaic.version = 11 : i64} {
  func.func @_netvlad_kernel(%arg0: i32, %arg1: memref<2x128x16xf32, #tpu.memory_space<vmem>>, %arg2: memref<64x128xf32, #tpu.memory_space<vmem>>, %arg3: memref<64x128xf32, #tpu.memory_space<vmem>>, %arg4: memref<2x64x128xf32, #tpu.memory_space<vmem>>) attributes {dimension_semantics = [#tpu.dimension_semantics<parallel>], iteration_bounds = array<i64: 2>, scalar_prefetch = 0 : i64, scratch_operands = 0 : i64, tpu.core_type = #tpu.core_type<tc>, window_params = [{transform_indices = @transform_0, window_bounds = array<i64: 2, 128, 16>}, {pipeline_mode = #tpu.pipeline_mode<synchronous>, transform_indices = @transform_1, window_bounds = array<i64: 64, 128>}, {pipeline_mode = #tpu.pipeline_mode<synchronous>, transform_indices = @transform_2, window_bounds = array<i64: 64, 128>}, {transform_indices = @transform_3, window_bounds = array<i64: 2, 64, 128>}]} {
    %c0 = arith.constant 0 : index
    %c0_0 = arith.constant 0 : index
    %0 = vector.load %arg2[%c0, %c0_0] : memref<64x128xf32, #tpu.memory_space<vmem>>, vector<64x128xf32>
    %c0_1 = arith.constant 0 : index
    %c0_2 = arith.constant 0 : index
    %1 = vector.load %arg3[%c0_1, %c0_2] : memref<64x128xf32, #tpu.memory_space<vmem>>, vector<64x128xf32>
    %c0_3 = arith.constant 0 : index
    %c0_4 = arith.constant 0 : index
    %c0_5 = arith.constant 0 : index
    %2 = vector.load %arg1[%c0_3, %c0_4, %c0_5] : memref<2x128x16xf32, #tpu.memory_space<vmem>>, vector<1x128x16xf32>
    %3 = vector.shape_cast %2 : vector<1x128x16xf32> to vector<128x16xf32>
    %4 = arith.mulf %3, %3 : vector<128x16xf32>
    %cst = arith.constant dense<0.000000e+00> : vector<16xf32>
    %5 = vector.multi_reduction <add>, %4, %cst [0] : vector<128x16xf32> to vector<16xf32>
    %6 = vector.shape_cast %5 : vector<16xf32> to vector<1x16xf32>
    %cst_6 = arith.constant 1.000000e-24 : f32
    %7 = vector.broadcast %cst_6 : f32 to vector<1x16xf32>
    %8 = arith.maximumf %6, %7 : vector<1x16xf32>
    %9 = math.rsqrt %8 : vector<1x16xf32>
    %cst_7 = arith.constant dense<0.000000e+00> : vector<64x16xf32>
    %10 = tpu.matmul %0, %3, %cst_7 {dimension_numbers = #tpu.dot_dimension_numbers<[1], [0], [0], [1], [0, 0, 1, 1], [], []>} : vector<64x128xf32>, vector<128x16xf32>, vector<64x16xf32> -> vector<64x16xf32>
    %11 = vector.broadcast %9 : vector<1x16xf32> to vector<64x16xf32>
    %12 = arith.mulf %10, %11 : vector<64x16xf32>
    %cst_8 = arith.constant dense<0xFF800000> : vector<16xf32>
    %13 = vector.multi_reduction <maximumf>, %12, %cst_8 [0] : vector<64x16xf32> to vector<16xf32>
    %14 = vector.shape_cast %13 : vector<16xf32> to vector<1x16xf32>
    %15 = vector.broadcast %14 : vector<1x16xf32> to vector<64x16xf32>
    %16 = arith.subf %12, %15 : vector<64x16xf32>
    %17 = math.exp %16 : vector<64x16xf32>
    %cst_9 = arith.constant dense<0.000000e+00> : vector<16xf32>
    %18 = vector.multi_reduction <add>, %17, %cst_9 [0] : vector<64x16xf32> to vector<16xf32>
    %19 = vector.shape_cast %18 : vector<16xf32> to vector<1x16xf32>
    %cst_10 = arith.constant 1.000000e+00 : f32
    %20 = vector.broadcast %cst_10 : f32 to vector<1x16xf32>
    %21 = arith.divf %20, %19 : vector<1x16xf32>
    %22 = vector.broadcast %21 : vector<1x16xf32> to vector<64x16xf32>
    %23 = arith.mulf %17, %22 : vector<64x16xf32>
    %cst_11 = arith.constant dense<0.000000e+00> : vector<64xf32>
    %24 = vector.multi_reduction <add>, %23, %cst_11 [1] : vector<64x16xf32> to vector<64xf32>
    %25 = vector.shape_cast %24 : vector<64xf32> to vector<64x1xf32>
    %26 = vector.broadcast %9 : vector<1x16xf32> to vector<64x16xf32>
    %27 = arith.mulf %23, %26 : vector<64x16xf32>
    %cst_12 = arith.constant dense<0.000000e+00> : vector<64x128xf32>
    %28 = tpu.matmul %27, %3, %cst_12 {dimension_numbers = #tpu.dot_dimension_numbers<[1], [1], [0], [0], [0, 0, 1, 0], [], []>} : vector<64x16xf32>, vector<128x16xf32>, vector<64x128xf32> -> vector<64x128xf32>
    %29 = vector.broadcast %25 : vector<64x1xf32> to vector<64x128xf32>
    %30 = arith.mulf %1, %29 : vector<64x128xf32>
    %31 = arith.subf %28, %30 : vector<64x128xf32>
    %32 = arith.mulf %31, %31 : vector<64x128xf32>
    %cst_13 = arith.constant dense<0.000000e+00> : vector<64xf32>
    %33 = vector.multi_reduction <add>, %32, %cst_13 [1] : vector<64x128xf32> to vector<64xf32>
    %34 = vector.shape_cast %33 : vector<64xf32> to vector<64x1xf32>
    %cst_14 = arith.constant 1.000000e-24 : f32
    %35 = vector.broadcast %cst_14 : f32 to vector<64x1xf32>
    %36 = arith.maximumf %34, %35 : vector<64x1xf32>
    %37 = math.rsqrt %36 : vector<64x1xf32>
    %38 = arith.mulf %37, %37 : vector<64x1xf32>
    %39 = arith.mulf %34, %38 : vector<64x1xf32>
    %40 = vector.shape_cast %39 : vector<64x1xf32> to vector<1x64x1xf32>
    %cst_15 = arith.constant dense<0.000000e+00> : vector<1xf32>
    %41 = vector.multi_reduction <add>, %40, %cst_15 [1, 2] : vector<1x64x1xf32> to vector<1xf32>
    %42 = vector.shape_cast %41 : vector<1xf32> to vector<1x1x1xf32>
    %43 = vector.extract %42[0, 0, 0] : f32 from vector<1x1x1xf32>
    %cst_16 = arith.constant 1.000000e-24 : f32
    %44 = arith.maximumf %43, %cst_16 : f32
    %45 = math.rsqrt %44 : f32
    %46 = vector.broadcast %45 : f32 to vector<64x1xf32>
    %47 = arith.mulf %37, %46 : vector<64x1xf32>
    %48 = vector.broadcast %47 : vector<64x1xf32> to vector<64x128xf32>
    %49 = arith.mulf %31, %48 : vector<64x128xf32>
    %c0_17 = arith.constant 0 : index
    %c0_18 = arith.constant 0 : index
    %c0_19 = arith.constant 0 : index
    %50 = vector.load %arg4[%c0_17, %c0_18, %c0_19] : memref<2x64x128xf32, #tpu.memory_space<vmem>>, vector<1x64x128xf32>
    %51 = vector.shape_cast %50 : vector<1x64x128xf32> to vector<64x128xf32>
    %52 = vector.shape_cast %49 : vector<64x128xf32> to vector<1x64x128xf32>
    tpu.vector_store %arg4[%c0_17, %c0_18, %c0_19], %52 {strides = array<i32>} : memref<2x64x128xf32, #tpu.memory_space<vmem>>, vector<1x64x128xf32>,
    %c1 = arith.constant 1 : index
    %c0_20 = arith.constant 0 : index
    %c0_21 = arith.constant 0 : index
    %53 = vector.load %arg1[%c1, %c0_20, %c0_21] : memref<2x128x16xf32, #tpu.memory_space<vmem>>, vector<1x128x16xf32>
    %54 = vector.shape_cast %53 : vector<1x128x16xf32> to vector<128x16xf32>
    %55 = arith.mulf %54, %54 : vector<128x16xf32>
    %cst_22 = arith.constant dense<0.000000e+00> : vector<16xf32>
    %56 = vector.multi_reduction <add>, %55, %cst_22 [0] : vector<128x16xf32> to vector<16xf32>
    %57 = vector.shape_cast %56 : vector<16xf32> to vector<1x16xf32>
    %cst_23 = arith.constant 1.000000e-24 : f32
    %58 = vector.broadcast %cst_23 : f32 to vector<1x16xf32>
    %59 = arith.maximumf %57, %58 : vector<1x16xf32>
    %60 = math.rsqrt %59 : vector<1x16xf32>
    %cst_24 = arith.constant dense<0.000000e+00> : vector<64x16xf32>
    %61 = tpu.matmul %0, %54, %cst_24 {dimension_numbers = #tpu.dot_dimension_numbers<[1], [0], [0], [1], [0, 0, 1, 1], [], []>} : vector<64x128xf32>, vector<128x16xf32>, vector<64x16xf32> -> vector<64x16xf32>
    %62 = vector.broadcast %60 : vector<1x16xf32> to vector<64x16xf32>
    %63 = arith.mulf %61, %62 : vector<64x16xf32>
    %cst_25 = arith.constant dense<0xFF800000> : vector<16xf32>
    %64 = vector.multi_reduction <maximumf>, %63, %cst_25 [0] : vector<64x16xf32> to vector<16xf32>
    %65 = vector.shape_cast %64 : vector<16xf32> to vector<1x16xf32>
    %66 = vector.broadcast %65 : vector<1x16xf32> to vector<64x16xf32>
    %67 = arith.subf %63, %66 : vector<64x16xf32>
    %68 = math.exp %67 : vector<64x16xf32>
    %cst_26 = arith.constant dense<0.000000e+00> : vector<16xf32>
    %69 = vector.multi_reduction <add>, %68, %cst_26 [0] : vector<64x16xf32> to vector<16xf32>
    %70 = vector.shape_cast %69 : vector<16xf32> to vector<1x16xf32>
    %cst_27 = arith.constant 1.000000e+00 : f32
    %71 = vector.broadcast %cst_27 : f32 to vector<1x16xf32>
    %72 = arith.divf %71, %70 : vector<1x16xf32>
    %73 = vector.broadcast %72 : vector<1x16xf32> to vector<64x16xf32>
    %74 = arith.mulf %68, %73 : vector<64x16xf32>
    %cst_28 = arith.constant dense<0.000000e+00> : vector<64xf32>
    %75 = vector.multi_reduction <add>, %74, %cst_28 [1] : vector<64x16xf32> to vector<64xf32>
    %76 = vector.shape_cast %75 : vector<64xf32> to vector<64x1xf32>
    %77 = vector.broadcast %60 : vector<1x16xf32> to vector<64x16xf32>
    %78 = arith.mulf %74, %77 : vector<64x16xf32>
    %cst_29 = arith.constant dense<0.000000e+00> : vector<64x128xf32>
    %79 = tpu.matmul %78, %54, %cst_29 {dimension_numbers = #tpu.dot_dimension_numbers<[1], [1], [0], [0], [0, 0, 1, 0], [], []>} : vector<64x16xf32>, vector<128x16xf32>, vector<64x128xf32> -> vector<64x128xf32>
    %80 = vector.broadcast %76 : vector<64x1xf32> to vector<64x128xf32>
    %81 = arith.mulf %1, %80 : vector<64x128xf32>
    %82 = arith.subf %79, %81 : vector<64x128xf32>
    %83 = arith.mulf %82, %82 : vector<64x128xf32>
    %cst_30 = arith.constant dense<0.000000e+00> : vector<64xf32>
    %84 = vector.multi_reduction <add>, %83, %cst_30 [1] : vector<64x128xf32> to vector<64xf32>
    %85 = vector.shape_cast %84 : vector<64xf32> to vector<64x1xf32>
    %cst_31 = arith.constant 1.000000e-24 : f32
    %86 = vector.broadcast %cst_31 : f32 to vector<64x1xf32>
    %87 = arith.maximumf %85, %86 : vector<64x1xf32>
    %88 = math.rsqrt %87 : vector<64x1xf32>
    %89 = arith.mulf %88, %88 : vector<64x1xf32>
    %90 = arith.mulf %85, %89 : vector<64x1xf32>
    %91 = vector.shape_cast %90 : vector<64x1xf32> to vector<1x64x1xf32>
    %cst_32 = arith.constant dense<0.000000e+00> : vector<1xf32>
    %92 = vector.multi_reduction <add>, %91, %cst_32 [1, 2] : vector<1x64x1xf32> to vector<1xf32>
    %93 = vector.shape_cast %92 : vector<1xf32> to vector<1x1x1xf32>
    %94 = vector.extract %93[0, 0, 0] : f32 from vector<1x1x1xf32>
    %cst_33 = arith.constant 1.000000e-24 : f32
    %95 = arith.maximumf %94, %cst_33 : f32
    %96 = math.rsqrt %95 : f32
    %97 = vector.broadcast %96 : f32 to vector<64x1xf32>
    %98 = arith.mulf %88, %97 : vector<64x1xf32>
    %99 = vector.broadcast %98 : vector<64x1xf32> to vector<64x128xf32>
    %100 = arith.mulf %82, %99 : vector<64x128xf32>
    %c1_34 = arith.constant 1 : index
    %c0_35 = arith.constant 0 : index
    %c0_36 = arith.constant 0 : index
    %101 = vector.load %arg4[%c1_34, %c0_35, %c0_36] : memref<2x64x128xf32, #tpu.memory_space<vmem>>, vector<1x64x128xf32>
    %102 = vector.shape_cast %101 : vector<1x64x128xf32> to vector<64x128xf32>
    %103 = vector.shape_cast %100 : vector<64x128xf32> to vector<1x64x128xf32>
    tpu.vector_store %arg4[%c1_34, %c0_35, %c0_36], %103 {strides = array<i32>} : memref<2x64x128xf32, #tpu.memory_space<vmem>>, vector<1x64x128xf32>,
    return
  }
  func.func @transform_0(%arg0: i32) -> (i32, i32, i32) {
    %c0_i32 = arith.constant 0 : i32
    %c0_i32_0 = arith.constant 0 : i32
    %c0_i32_1 = arith.constant 0 : i32
    return %arg0, %c0_i32, %c0_i32_0 : i32, i32, i32
  }
  func.func @transform_1(%arg0: i32) -> (i32, i32) {
    %c0_i32 = arith.constant 0 : i32
    %c0_i32_0 = arith.constant 0 : i32
    %c0_i32_1 = arith.constant 0 : i32
    return %c0_i32, %c0_i32_0 : i32, i32
  }
  func.func @transform_2(%arg0: i32) -> (i32, i32) {
    %c0_i32 = arith.constant 0 : i32
    %c0_i32_0 = arith.constant 0 : i32
    %c0_i32_1 = arith.constant 0 : i32
    return %c0_i32, %c0_i32_0 : i32, i32
  }
  func.func @transform_3(%arg0: i32) -> (i32, i32, i32) {
    %c0_i32 = arith.constant 0 : i32
    %c0_i32_0 = arith.constant 0 : i32
    %c0_i32_1 = arith.constant 0 : i32
    return %arg0, %c0_i32, %c0_i32_0 : i32, i32, i32
  }
}

</mosaic_0001>

<bundles_post_ra>
// kernel: tpu_custom_call.1
= control target key start
LH: loop header
LB: loop body
LE: loop exit
PB: predicated region body
PF: predicated region fallthrough
CT: control target
= control target key end

     0   :  { %8 = vsyncpa [#allocation3], 0  ;;  %s3000_s0 = inlined_call_operand.vmem [shape: f32[4,128,16], index: 0, kind: input, shape index: {}]   ;;  %s3001_s1 = inlined_call_operand.vmem [shape: f32[64,128], index: 1, kind: input, shape index: {}]   ;;  %s3002_s2 = inlined_call_operand.vmem [shape: f32[64,128], index: 2, kind: input, shape index: {}]   ;;  %s3003_s3 = inlined_call_operand.hbm [shape: f32[4,64,128], index: 3, kind: output, shape index: {}]  }
   0x1   :  { %10 = vsyncpa [#allocation3 + $0x1], 0  ;;  %s2033_s12 = smov 0   ;;  %s2035_s13 = smov 0  }
   0x2   :  { %s2037_s14 = smov 0   ;;  %s2039_s15 = smov 0  }
   0x3 LB: > { %s2054_s16 = sadd.s32 4294967295, %s2007_s15   ;;  %s1460_s17 = sadd.s32 4294967294, %s2007_s15   ;;  %s2007_s15 = sphi %s2039_s15, %s3009_s15   ;;  %s2003_s14 = sphi %s2037_s14, %s3008_s14   ;;  %s1999_s13 = sphi %s2035_s13, %s3007_s13   ;;  %s1995_s12 = sphi %s2033_s12, %s3006_s12  }
   0x4   : > { %s2058_s18 = sadd.s32 1, %s2007_s15   ;;  %s91_s19 = sadd.s32 1, %s2003_s14 }
   0x5   : > { %s88_s20 = ssub.s32 %s2007_s15, %s2058_s18  ;;  %p101_p0 = scmp.ne.s32.totalorder %s2003_s14, %s1999_s13 }
   0x6   : > { %p89_p1 = scmp.eq.s32.totalorder %s88_s20, 0  ;;  %p102_p2 = scmp.eq.s32.totalorder %s2054_s16, 1 }
   0x7   : > { %p107_p3 = scmp.ne.s32.totalorder %s1999_s13, %s1995_s12  ;;  %p108_p4 = scmp.eq.s32.totalorder %s1460_s17, 1 }
   0x8   : > { %s2069_s21 = scalar_select %p89_p1, %s2003_s14, %s91_s19  }
   0x9   : > { %p2071_p5 = por %p102_p2, %p101_p0  ;;  %p2075_p6 = por %p108_p4, %p107_p3 }
   0xa   : > { %p1463_p7 = scmp.ge.s32.totalorder %s2007_s15, 1  ;;  %p142_p8 = scmp.lt.s32.totalorder %s2007_s15, 3 }
   0xc   : > { %p143_p9 = pnand %p1463_p7, %p142_p8 }
   0xd   : > { %s1465_s24 = sshll.u32 (!%p143_p9), %s2054_s16, 1  ;;  %s2009_s26 = smov (!%p143_p9), 1e-24  }
   0xe   : > { %146 = sbr.rel (%p143_p9) target bundleno = 1152 (0x480), region = 32  ;;  %p168_p10 = scmp.lt.s32.totalorder (!%p143_p9), %s1465_s24, 3 }
   0xf   : > { %s164_s28 = sand.u32 (!%p143_p9), 1, %s1999_s13   ;;  %s1548_s8 = sshll.u32 (!%p143_p9), %s2054_s16, 11 }
  0x10   : > { %s1464_s29 = sshll.u32 (!%p143_p9), %s164_s28, 7  ;;  %s2942_s11 = scalar_lea.hbm (!%p143_p9), %s3003_s3, %s1548_s8 }
  0x11   : > { %s2914_s4 = scalar_lea.vmem (!%p143_p9), [#allocation2], %s1464_s29  ;;  %s2960_s17 = scalar_lea.sflag (!%p143_p9), [#allocation3], %s164_s28 }
  0x12   : > { %s1398_s9 = sshll.u32 (!%p143_p9), %s2914_s4, 4  ;;  %s2010_s20 = smov (!%p143_p9), [#allocation2]   ;;  %s2944_s9 = int_to_ptr.vmem [resolvable:$true] %s1398_s9 }
  0x13   : > { %v175_v0 = vld [vmem:[%s3001_s1] sm:$0xff]  ;;  %s3011_s24 = smov (!%p168_p10, %s1465_s24), 3  ;;  %vm223_vm0 = vcmask 130048   ;;  %vm733_vm1 = vcmask 7168   ;;  %s1947_s19 = scalar_lea.vmem %s2944_s9, 2048 }
  0x14   : > { %1677 = vmatprep.mubr.f32.mxu1 %v175_v0  ;;  %1765 = vmatprep.mubr.f32.mxu0 %v175_v0  ;;  %s1546_s27 = sshll.u32 %s3011_s24, 7  ;;  %p1948_p11 = scmp.ne.s32.totalorder %s2944_s9, %s1947_s19 }
  0x15   : > { %s2088_s30 = scalar_lea.vmem %s3000_s0, %s1546_s27  ;;  %s1951_s24 = sshll.u32 %s2010_s20, 4  ;;  %s1952_s24 = int_to_ptr.vmem [resolvable:$false] %s1951_s24 }
  0x16   : > { %v2091_v1 = vld [vmem:[%s2088_s30 + $0x78] sm:$0xff]  ;;  %v2094_v2 = vld [vmem:[%s2088_s30 + $0x70] sm:$0xff]  ;;  %v2106_v5 = vld [vmem:[%s2088_s30 + $0x68] sm:$0xff]  ;;  %p1949_p12 = pnand %p1948_p11, %p2071_p5  ;;  %p1954_p0 = scmp.lt.s32.totalorder %s2944_s9, %s1952_s24 }
  0x17   : > { %v2097_v3 = vld [vmem:[%s2088_s30 + $0xf8] sm:$0xff]  ;;  %1645 = vmatprep.subr.mxu1 %v2091_v1  ;;  %v2102_v4 = vld [vmem:[%s2088_s30 + $0xf0] sm:$0xff]  ;;  %v2110_v6 = vld [vmem:[%s2088_s30 + $0xe8] sm:$0xff] }
  0x18   : > { %1733 = vmatprep.subr.mxu0 %v2097_v3  ;;  %1646 = vmatpush3.msra.mxu1 %v2091_v1  ;;  %v2116_v7 = vld [vmem:[%s2088_s30 + $0x60] sm:$0xff]  ;;  %v2126_v9 = vld [vmem:[%s2088_s30 + $0x58] sm:$0xff]  ;;  %v2136_v11 = vld [vmem:[%s2088_s30 + $0x50] sm:$0xff]  ;;  %p1950_p13 = pneg %p1949_p12 }
  0x19   : > { %1734 = vmatpush3.msra.mxu0 %v2097_v3  ;;  %1647 = vmatprep.subr.mxu1 %v2094_v2  ;;  %v2120_v8 = vld [vmem:[%s2088_s30 + $0xe0] sm:$0xff]  ;;  %v2130_v10 = vld [vmem:[%s2088_s30 + $0xd8] sm:$0xff]  ;;  %v2140_v12 = vld [vmem:[%s2088_s30 + $0xd0] sm:$0xff] }
  0x1a   : > { %1735 = vmatprep.subr.mxu0 %v2102_v4  ;;  %1648 = vmatpush3.msra.mxu1 %v2094_v2  ;;  %v2145_v13 = vld [vmem:[%s2088_s30] sm:$0xff]  ;;  %v2148_v14 = vld [vmem:[%s2088_s30 + $0x8] sm:$0xff]  ;;  %v2151_v15 = vld [vmem:[%s2088_s30 + $0x10] sm:$0xff] }
  0x1b   : > { %1736 = vmatpush3.msra.mxu0 %v2102_v4  ;;  %1649 = vmatprep.subr.mxu1 %v2106_v5  ;;  %v2155_v16 = vld [vmem:[%s2088_s30 + $0x48] sm:$0xff]  ;;  %v2162_v18 = vld [vmem:[%s2088_s30 + $0x18] sm:$0xff]  ;;  %v207_v19 = vmul.f32 %v2145_v13, %v2145_v13  ;;  %v208_v20 = vmul.f32 %v2148_v14, %v2148_v14  ;;  %v209_v21 = vmul.f32 %v2151_v15, %v2151_v15  ;;  %v2173_v22 = vld [vmem:[%s2088_s30 + $0x40] sm:$0xff] }
  0x1c   : > { %1737 = vmatprep.subr.mxu0 %v2110_v6  ;;  %1650 = vmatpush3.msra.mxu1 %v2106_v5  ;;  %v2159_v17 = vld [vmem:[%s2088_s30 + $0xc8] sm:$0xff]  ;;  %v2176_v23 = vld [vmem:[%s2088_s30 + $0x20] sm:$0xff]  ;;  %v210_v24 = vmul.f32 %v2162_v18, %v2162_v18  ;;  %v2183_v25 = vld [vmem:[%s2088_s30 + $0x38] sm:$0xff]  ;;  %v215_v63 = vmul.f32 %v2173_v22, %v2173_v22 }
  0x1d   : > { %1738 = vmatpush3.msra.mxu0 %v2110_v6  ;;  %1651 = vmatprep.subr.mxu1 %v2116_v7  ;;  %v2186_v26 = vld [vmem:[%s2088_s30 + $0xc0] sm:$0xff]  ;;  %v2189_v27 = vld [vmem:[%s2088_s30 + $0x30] sm:$0xff]  ;;  %v211_v28 = vmul.f32 %v2176_v23, %v2176_v23  ;;  %v224_v29 = vsel %vm223_vm0, %v207_v19, 0.0  ;;  %v225_v30 = vsel %vm223_vm0, %v208_v20, 0.0  ;;  %v2200_v32 = vld [vmem:[%s2088_s30 + $0x28] sm:$0xff]  ;;  %v227_v34 = vsel %vm223_vm0, %v209_v21, 0.0 }
  0x1e   : > { %1739 = vmatprep.subr.mxu0 %v2120_v8  ;;  %1652 = vmatpush3.msra.mxu1 %v2116_v7  ;;  %v213_v31 = vmul.f32 %v2189_v27, %v2189_v27  ;;  %v226_v33 = vadd.f32 %v225_v30, %v224_v29  ;;  %v2204_v35 = vld [vmem:[%s2088_s30 + $0x80] sm:$0xff]  ;;  %v2207_v36 = vld [vmem:[%s2088_s30 + $0x88] sm:$0xff]  ;;  %v2212_v37 = vld [vmem:[%s2088_s30 + $0xb8] sm:$0xff]  ;;  %v212_v38 = vmul.f32 %v2200_v32, %v2200_v32  ;;  %v229_v39 = vsel %vm223_vm0, %v210_v24, 0.0 }
  0x1f   : > { %1740 = vmatpush3.msra.mxu0 %v2120_v8  ;;  %1653 = vmatprep.subr.mxu1 %v2126_v9  ;;  %v2218_v40 = vld [vmem:[%s2088_s30 + $0x90] sm:$0xff]  ;;  %v2221_v41 = vld [vmem:[%s2088_s30 + $0x98] sm:$0xff]  ;;  %v804_v42 = vmul.f32 %v2204_v35, %v2204_v35  ;;  %v805_v43 = vmul.f32 %v2207_v36, %v2207_v36  ;;  %v2230_v45 = vld [vmem:[%s2088_s30 + $0xa0] sm:$0xff]  ;;  %v231_v48 = vsel %vm223_vm0, %v211_v28, 0.0  ;;  %v214_v57 = vmul.f32 %v2183_v25, %v2183_v25 }
  0x20   : > { %1741 = vmatprep.subr.mxu0 %v2130_v10  ;;  %1654 = vmatpush3.msra.mxu1 %v2126_v9  ;;  %v228_v44 = vadd.f32 %v227_v34, %v226_v33  ;;  %v806_v46 = vmul.f32 %v2218_v40, %v2218_v40  ;;  %v807_v47 = vmul.f32 %v2221_v41, %v2221_v41  ;;  %v2240_v49 = vld [vmem:[%s2088_s30 + $0xb0] sm:$0xff]  ;;  %v2249_v54 = vld [vmem:[%s2088_s30 + $0xa8] sm:$0xff]  ;;  %v233_v58 = vsel %vm223_vm0, %v212_v38, 0.0 }
  0x21   : > { %1742 = vmatpush3.msra.mxu0 %v2130_v10  ;;  %1655 = vmatprep.subr.mxu1 %v2136_v11  ;;  %v808_v50 = vmul.f32 %v2230_v45, %v2230_v45  ;;  %v820_v51 = vsel %vm223_vm0, %v804_v42, 0.0  ;;  %v821_v52 = vsel %vm223_vm0, %v805_v43, 0.0  ;;  %v809_v59 = vmul.f32 %v2249_v54, %v2249_v54 }
  0x22   : > { %1743 = vmatprep.subr.mxu0 %v2140_v12  ;;  %1656 = vmatpush3.msra.mxu1 %v2136_v11  ;;  %v230_v53 = vadd.f32 %v229_v39, %v228_v44  ;;  %v822_v55 = vadd.f32 %v821_v52, %v820_v51  ;;  %v823_v56 = vsel %vm223_vm0, %v806_v46, 0.0  ;;  %v825_v60 = vsel %vm223_vm0, %v807_v47, 0.0 }
  0x23   : > { %1744 = vmatpush3.msra.mxu0 %v2140_v12  ;;  %1657 = vmatprep.subr.mxu1 %v2155_v16  ;;  %v235_v0 = vsel %vm223_vm0, %v213_v31, 0.0  ;;  %v810_v19 = vmul.f32 %v2240_v49, %v2240_v49  ;;  %v827_v20 = vsel %vm223_vm0, %v808_v50, 0.0  ;;  %v216_v28 = vmul.f32 %v2155_v16, %v2155_v16 }
  0x24   : > { %1745 = vmatprep.subr.mxu0 %v2159_v17  ;;  %1658 = vmatpush3.msra.mxu1 %v2155_v16  ;;  %v232_v61 = vadd.f32 %v231_v48, %v230_v53  ;;  %v824_v62 = vadd.f32 %v823_v56, %v822_v55  ;;  %v237_v29 = vsel %vm223_vm0, %v214_v57, 0.0  ;;  %v811_v30 = vmul.f32 %v2212_v37, %v2212_v37 }
  0x25   : > { %1746 = vmatpush3.msra.mxu0 %v2159_v17  ;;  %1659 = vmatprep.subr.mxu1 %v2173_v22  ;;  %v829_v31 = vsel %vm223_vm0, %v809_v59, 0.0  ;;  %v217_v38 = vmul.f32 %v2136_v11, %v2136_v11  ;;  %v239_v39 = vsel %vm223_vm0, %v215_v63, 0.0  ;;  %v812_v42 = vmul.f32 %v2186_v26, %v2186_v26 }
  0x26   : > { %1747 = vmatprep.subr.mxu0 %v2186_v26  ;;  %1660 = vmatpush3.msra.mxu1 %v2173_v22  ;;  %v234_v21 = vadd.f32 %v233_v58, %v232_v61  ;;  %v826_v24 = vadd.f32 %v825_v60, %v824_v62  ;;  %v831_v43 = vsel %vm223_vm0, %v810_v19, 0.0  ;;  %v218_v47 = vmul.f32 %v2126_v9, %v2126_v9  ;;  %v176_v19 = vld [vmem:[%s3001_s1 + $0x8] sm:$0xff] }
  0x27   : > { %1748 = vmatpush3.msra.mxu0 %v2186_v26  ;;  %1661 = vmatprep.subr.mxu1 %v2183_v25  ;;  %v241_v48 = vsel %vm223_vm0, %v216_v28, 0.0  ;;  %v813_v50 = vmul.f32 %v2159_v17, %v2159_v17  ;;  %v833_v51 = vsel %vm223_vm0, %v811_v30, 0.0  ;;  %v219_v55 = vmul.f32 %v2116_v7, %v2116_v7 }
  0x28   : > { %1749 = vmatprep.subr.mxu0 %v2212_v37  ;;  %1662 = vmatpush3.msra.mxu1 %v2183_v25  ;;  %v236_v33 = vadd.f32 %v235_v0, %v234_v21  ;;  %v828_v34 = vadd.f32 %v827_v20, %v826_v24  ;;  %v243_v56 = vsel %vm223_vm0, %v217_v38, 0.0  ;;  %v814_v57 = vmul.f32 %v2140_v12, %v2140_v12  ;;  %v177_v24 = vld [vmem:[%s3001_s1 + $0x10] sm:$0xff] }
  0x29   : > { %1750 = vmatpush3.msra.mxu0 %v2212_v37  ;;  %1663 = vmatprep.subr.mxu1 %v2189_v27  ;;  %v835_v58 = vsel %vm223_vm0, %v812_v42, 0.0  ;;  %v220_v61 = vmul.f32 %v2106_v5, %v2106_v5  ;;  %v245_v62 = vsel %vm223_vm0, %v218_v47, 0.0  ;;  %v815_v63 = vmul.f32 %v2130_v10, %v2130_v10 }
  0x2a   : > { %1751 = vmatprep.subr.mxu0 %v2240_v49  ;;  %1664 = vmatpush3.msra.mxu1 %v2189_v27  ;;  %v238_v44 = vadd.f32 %v237_v29, %v236_v33  ;;  %v830_v46 = vadd.f32 %v829_v31, %v828_v34  ;;  %v837_v0 = vsel %vm223_vm0, %v813_v50, 0.0  ;;  %v221_v28 = vmul.f32 %v2094_v2, %v2094_v2 }
  0x2b   : > { %1752 = vmatpush3.msra.mxu0 %v2240_v49  ;;  %1665 = vmatprep.subr.mxu1 %v2200_v32  ;;  %v247_v29 = vsel %vm223_vm0, %v219_v55, 0.0  ;;  %v816_v30 = vmul.f32 %v2120_v8, %v2120_v8  ;;  %v839_v31 = vsel %vm223_vm0, %v814_v57, 0.0  ;;  %v222_v38 = vmul.f32 %v2091_v1, %v2091_v1 }
  0x2c   : > { %1753 = vmatprep.subr.mxu0 %v2249_v54  ;;  %1666 = vmatpush3.msra.mxu1 %v2200_v32  ;;  %v240_v52 = vadd.f32 %v239_v39, %v238_v44  ;;  %v832_v53 = vadd.f32 %v831_v43, %v830_v46  ;;  %v249_v39 = vsel %vm223_vm0, %v220_v61, 0.0  ;;  %v817_v42 = vmul.f32 %v2110_v6, %v2110_v6  ;;  %v178_v44 = vld [vmem:[%s3001_s1 + $0x18] sm:$0xff]  ;;  %v181_v61 = vld [vmem:[%s3001_s1 + $0x30] sm:$0xff] }
  0x2d   : > { %1754 = vmatpush3.msra.mxu0 %v2249_v54  ;;  %1667 = vmatprep.subr.mxu1 %v2176_v23  ;;  %v841_v43 = vsel %vm223_vm0, %v815_v63, 0.0  ;;  %v251_v50 = vsel %vm223_vm0, %v221_v28, 0.0  ;;  %v819_v57 = vmul.f32 %v2097_v3, %v2097_v3 }
  0x2e   : > { %1755 = vmatprep.subr.mxu0 %v2230_v45  ;;  %1668 = vmatpush3.msra.mxu1 %v2176_v23  ;;  %v242_v59 = vadd.f32 %v241_v48, %v240_v52  ;;  %v834_v60 = vadd.f32 %v833_v51, %v832_v53  ;;  %v179_v48 = vld [vmem:[%s3001_s1 + $0x20] sm:$0xff]  ;;  %v818_v51 = vmul.f32 %v2102_v4, %v2102_v4  ;;  %v843_v52 = vsel %vm223_vm0, %v816_v30, 0.0 }
  0x2f   : > { %1756 = vmatpush3.msra.mxu0 %v2230_v45  ;;  %1669 = vmatprep.subr.mxu1 %v2162_v18 }
  0x30   : > { %1757 = vmatprep.subr.mxu0 %v2221_v41  ;;  %1670 = vmatpush3.msra.mxu1 %v2162_v18  ;;  %v244_v20 = vadd.f32 %v243_v56, %v242_v59  ;;  %v836_v21 = vadd.f32 %v835_v58, %v834_v60  ;;  %v253_v56 = vsel %vm223_vm0, %v222_v38, 0.0  ;;  %v845_v58 = vsel %vm223_vm0, %v817_v42, 0.0  ;;  %v180_v59 = vld [vmem:[%s3001_s1 + $0x28] sm:$0xff] }
  0x31   : > { %1758 = vmatpush3.msra.mxu0 %v2221_v41  ;;  %1671 = vmatprep.subr.mxu1 %v2151_v15 }
  0x32   : > { %1759 = vmatprep.subr.mxu0 %v2218_v40  ;;  %1672 = vmatpush3.msra.mxu1 %v2151_v15  ;;  %v246_v33 = vadd.f32 %v245_v62, %v244_v20  ;;  %v838_v34 = vadd.f32 %v837_v0, %v836_v21  ;;  %v849_v0 = vsel %vm223_vm0, %v819_v57, 0.0 }
  0x33   : > { %1760 = vmatpush3.msra.mxu0 %v2218_v40  ;;  %1673 = vmatprep.subr.mxu1 %v2148_v14 }
  0x34   : > { %1761 = vmatprep.subr.mxu0 %v2207_v36  ;;  %1674 = vmatpush3.msra.mxu1 %v2148_v14  ;;  %v248_v46 = vadd.f32 %v247_v29, %v246_v33  ;;  %v840_v47 = vadd.f32 %v839_v31, %v838_v34 }
  0x35   : > { %1762 = vmatpush3.msra.mxu0 %v2207_v36  ;;  %1675 = vmatprep.subr.mxu1 %v2145_v13 }
  0x36   : > { %1763 = vmatprep.subr.mxu0 %v2204_v35  ;;  %1676 = vmatpush3.msra.mxu1 %v2145_v13  ;;  %v250_v53 = vadd.f32 %v249_v39, %v248_v46  ;;  %v842_v55 = vadd.f32 %v841_v43, %v840_v47 }
  0x37   : > { %1764 = vmatpush3.msra.mxu0 %v2204_v35  ;;  %1678 = vmatmul.mubr.f32.vlgmr.msra.gmra.mxu1 %v176_v19 }
  0x38   : > { %1766 = vmatmul.mubr.f32.vlgmr.msra.gmra.mxu0 %v176_v19  ;;  %1680 = vmatprep.mubr.f32.mxu1 %v177_v24  ;;  %v844_v60 = vadd.f32 %v843_v52, %v842_v55  ;;  %v182_v19 = vld [vmem:[%s3001_s1 + $0x38] sm:$0xff] }
  0x39   : > { %1768 = vmatprep.mubr.f32.mxu0 %v177_v24  ;;  %1689 = vmatprep.subr.msk.mxu1 %vm223_vm0, %v2091_v1 }
  0x3a   : > { %1777 = vmatprep.subr.msk.mxu0 %vm223_vm0, %v2097_v3  ;;  %1690 = vmatpush3.xpose.msk.msra.mxu1 %vm223_vm0, %v2091_v1  ;;  %v252_v1 = vadd.f32 %v251_v50, %v250_v53  ;;  %v846_v63 = vadd.f32 %v845_v58, %v844_v60 }
  0x3b   : > { %1778 = vmatpush3.xpose.msk.msra.mxu0 %vm223_vm0, %v2097_v3  ;;  %1681 = vmatmul.mubr.f32.gmra.mxu1 %v178_v44  ;;  %v847_v3 = vsel %vm223_vm0, %v818_v51, 0.0 }
  0x3c   : > { %1769 = vmatmul.mubr.f32.gmra.mxu0 %v178_v44  ;;  %1683 = vmatprep.mubr.f32.mxu1 %v179_v48  ;;  %v2379_v62 = vadd.f32 %v253_v56, %v252_v1  ;;  %v848_v20 = vadd.f32 %v847_v3, %v846_v63 }
  0x3d   : > { %1771 = vmatprep.mubr.f32.mxu0 %v179_v48  ;;  %1691 = vmatprep.subr.msk.mxu1 %vm223_vm0, %v2094_v2 }
  0x3e   : > { %1779 = vmatprep.subr.msk.mxu0 %vm223_vm0, %v2102_v4  ;;  %1692 = vmatpush3.xpose.msk.msra.mxu1 %vm223_vm0, %v2094_v2  ;;  %v850_v2 = vadd.f32 %v849_v0, %v848_v20 }
  0x3f   : > { %1780 = vmatpush3.xpose.msk.msra.mxu0 %vm223_vm0, %v2102_v4  ;;  %1684 = vmatmul.mubr.f32.gmra.mxu1 %v180_v59 }
  0x40   : > { %1772 = vmatmul.mubr.f32.gmra.mxu0 %v180_v59  ;;  %1686 = vmatprep.mubr.f32.mxu1 %v181_v61  ;;  %v851_v4 = vrot.slane %v850_v2, 4 }
  0x41   : > { %1774 = vmatprep.mubr.f32.mxu0 %v181_v61  ;;  %1693 = vmatprep.subr.msk.mxu1 %vm223_vm0, %v2106_v5 }
  0x42   : > { %1781 = vmatprep.subr.msk.mxu0 %vm223_vm0, %v2110_v6  ;;  %1694 = vmatpush3.xpose.msk.msra.mxu1 %vm223_vm0, %v2106_v5  ;;  %v255_v5 = vrot.slane %v2379_v62, 4 }
  0x43   : > { %1782 = vmatpush3.xpose.msk.msra.mxu0 %vm223_vm0, %v2110_v6  ;;  %1687 = vmatmul.mubr.f32.gmra.mxu1 %v182_v19  ;;  %v852_v6 = vadd.f32 %v851_v4, %v850_v2 }
  0x44   : > { %1775 = vmatmul.mubr.f32.gmra.mxu0 %v182_v19  ;;  %1695 = vmatprep.subr.msk.mxu1 %vm223_vm0, %v2116_v7 }
  0x45   : > { %1783 = vmatprep.subr.msk.mxu0 %vm223_vm0, %v2120_v8 }
  0x46   : > { %1696 = vmatpush3.xpose.msk.msra.mxu1 %vm223_vm0, %v2116_v7  ;;  %v256_v7 = vadd.f32 %v255_v5, %v2379_v62 }
  0x47   : > { %1784 = vmatpush3.xpose.msk.msra.mxu0 %vm223_vm0, %v2120_v8  ;;  %1697 = vmatprep.subr.msk.mxu1 %vm223_vm0, %v2126_v9  ;;  %v853_v8 = vrot.slane %v852_v6, 2 }
  0x48   : > { %1785 = vmatprep.subr.msk.mxu0 %vm223_vm0, %v2130_v10 }
  0x4a   : > { %1698 = vmatpush3.xpose.msk.msra.mxu1 %vm223_vm0, %v2126_v9  ;;  %v257_v9 = vrot.slane %v256_v7, 2 }
  0x4b   : > { %1786 = vmatpush3.xpose.msk.msra.mxu0 %vm223_vm0, %v2130_v10  ;;  %1699 = vmatprep.subr.msk.mxu1 %vm223_vm0, %v2136_v11  ;;  %v854_v10 = vadd.f32 %v853_v8, %v852_v6 }
  0x4c   : > { %1787 = vmatprep.subr.msk.mxu0 %vm223_vm0, %v2140_v12 }
  0x4e   : > { %1700 = vmatpush3.xpose.msk.msra.mxu1 %vm223_vm0, %v2136_v11  ;;  %v258_v11 = vadd.f32 %v257_v9, %v256_v7 }
  0x4f   : > { %1788 = vmatpush3.xpose.msk.msra.mxu0 %vm223_vm0, %v2140_v12  ;;  %1701 = vmatprep.subr.msk.mxu1 %vm223_vm0, %v2155_v16  ;;  %v855_v12 = vrot.slane %v854_v10, 1 }
  0x50   : > { %1789 = vmatprep.subr.msk.mxu0 %vm223_vm0, %v2159_v17 }
  0x52   : > { %1702 = vmatpush3.xpose.msk.msra.mxu1 %vm223_vm0, %v2155_v16 }
  0x53   : > { %1790 = vmatpush3.xpose.msk.msra.mxu0 %vm223_vm0, %v2159_v17  ;;  %1703 = vmatprep.subr.msk.mxu1 %vm223_vm0, %v2173_v22 }
  0x54   : > { %1791 = vmatprep.subr.msk.mxu0 %vm223_vm0, %v2186_v26 }
  0x56   : > { %1704 = vmatpush3.xpose.msk.msra.mxu1 %vm223_vm0, %v2173_v22 }
  0x57   : > { %1792 = vmatpush3.xpose.msk.msra.mxu0 %vm223_vm0, %v2186_v26  ;;  %1705 = vmatprep.subr.msk.mxu1 %vm223_vm0, %v2183_v25 }
  0x58   : > { %1793 = vmatprep.subr.msk.mxu0 %vm223_vm0, %v2212_v37 }
  0x5a   : > { %1706 = vmatpush3.xpose.msk.msra.mxu1 %vm223_vm0, %v2183_v25 }
  0x5b   : > { %1794 = vmatpush3.xpose.msk.msra.mxu0 %vm223_vm0, %v2212_v37  ;;  %1707 = vmatprep.subr.msk.mxu1 %vm223_vm0, %v2189_v27 }
  0x5c   : > { %1795 = vmatprep.subr.msk.mxu0 %vm223_vm0, %v2240_v49 }
  0x5e   : > { %1708 = vmatpush3.xpose.msk.msra.mxu1 %vm223_vm0, %v2189_v27 }
  0x5f   : > { %1796 = vmatpush3.xpose.msk.msra.mxu0 %vm223_vm0, %v2240_v49  ;;  %1709 = vmatprep.subr.msk.mxu1 %vm223_vm0, %v2200_v32 }
  0x60   : > { %1797 = vmatprep.subr.msk.mxu0 %vm223_vm0, %v2249_v54 }
  0x62   : > { %1710 = vmatpush3.xpose.msk.msra.mxu1 %vm223_vm0, %v2200_v32 }
  0x63   : > { %1798 = vmatpush3.xpose.msk.msra.mxu0 %vm223_vm0, %v2249_v54  ;;  %1711 = vmatprep.subr.msk.mxu1 %vm223_vm0, %v2176_v23 }
  0x64   : > { %1799 = vmatprep.subr.msk.mxu0 %vm223_vm0, %v2230_v45 }
  0x66   : > { %1712 = vmatpush3.xpose.msk.msra.mxu1 %vm223_vm0, %v2176_v23 }
  0x67   : > { %1800 = vmatpush3.xpose.msk.msra.mxu0 %vm223_vm0, %v2230_v45  ;;  %1713 = vmatprep.subr.msk.mxu1 %vm223_vm0, %v2162_v18 }
  0x68   : > { %1801 = vmatprep.subr.msk.mxu0 %vm223_vm0, %v2221_v41 }
  0x6a   : > { %1714 = vmatpush3.xpose.msk.msra.mxu1 %vm223_vm0, %v2162_v18 }
  0x6b   : > { %1802 = vmatpush3.xpose.msk.msra.mxu0 %vm223_vm0, %v2221_v41  ;;  %1715 = vmatprep.subr.msk.mxu1 %vm223_vm0, %v2151_v15 }
  0x6c   : > { %1803 = vmatprep.subr.msk.mxu0 %vm223_vm0, %v2218_v40 }
  0x6e   : > { %1716 = vmatpush3.xpose.msk.msra.mxu1 %vm223_vm0, %v2151_v15  ;;  %v856_v15 = vadd.f32 %v855_v12, %v854_v10 }
  0x6f   : > { %1804 = vmatpush3.xpose.msk.msra.mxu0 %vm223_vm0, %v2218_v40  ;;  %1717 = vmatprep.subr.msk.mxu1 %vm223_vm0, %v2148_v14 }
  0x70   : > { %1805 = vmatprep.subr.msk.mxu0 %vm223_vm0, %v2207_v36  ;;  %v857_v17 = vmax.f32 %v856_v15, 1e-24 }
  0x72   : > { %1718 = vmatpush3.xpose.msk.msra.mxu1 %vm223_vm0, %v2148_v14  ;;  %v259_v14 = vrot.slane %v258_v11, 1  ;;  %1871 = vrsqrt.f32 %v857_v17 }
  0x73   : > { %1806 = vmatpush3.xpose.msk.msra.mxu0 %vm223_vm0, %v2207_v36  ;;  %1719 = vmatprep.subr.msk.mxu1 %vm223_vm0, %v2145_v13 }
  0x74   : > { %1807 = vmatprep.subr.msk.mxu0 %vm223_vm0, %v2204_v35  ;;  %v260_v16 = vadd.f32 %v259_v14, %v258_v11 }
  0x76   : > { %1720 = vmatpush3.xpose.msk.msra.mxu1 %vm223_vm0, %v2145_v13  ;;  %v261_v18 = vmax.f32 %v260_v16, 1e-24 }
  0x77   : > { %1808 = vmatpush3.xpose.msk.msra.mxu0 %vm223_vm0, %v2204_v35 }
  0x78   : > { %1873 = vrsqrt.f32 %v261_v18 }
  0x7f   : > { %v2499_v26 = vpop.eup %1871 }
  0x85   : > { %v2504_v40 = vpop.eup %1873 }
  0xf7   : > { %v1679_v13 = vpop.f32.mrf.mxu1 }
  0xf8   : > { %v1767_v22 = vpop.f32.mrf.mxu0  ;;  %v2519_v28 = vmul.f32 %v2504_v40, %v1679_v13 }
  0xf9   : > { %v329_v23 = vpop.f32.mrf.mxu1  ;;  %v2502_v35 = vmul.f32 %v2499_v26, %v1767_v22 }
  0xfa   : > { %v925_v25 = vpop.f32.mrf.mxu0  ;;  %v2510_v45 = vmul.f32 %v2504_v40, %v329_v23  ;;  %v377_v19 = vsel %vm223_vm0, %v2519_v28, -inf }
  0xfb   : > { %v1682_v27 = vpop.f32.mrf.mxu1  ;;  %v2507_v41 = vmul.f32 %v2499_v26, %v925_v25  ;;  %v973_v29 = vsel %vm223_vm0, %v2502_v35, -inf }
  0xfc   : > { %v1770_v32 = vpop.f32.mrf.mxu0  ;;  %v376_v44 = vsel %vm223_vm0, %v2510_v45, -inf  ;;  %v2542_v46 = vmul.f32 %v2504_v40, %v1682_v27 }
  0xfd   : > { %v339_v36 = vpop.f32.mrf.mxu1  ;;  %v2513_v49 = vmul.f32 %v2499_v26, %v1770_v32  ;;  %v972_v38 = vsel %vm223_vm0, %v2507_v41, -inf }
  0xfe   : > { %v935_v37 = vpop.f32.mrf.mxu0  ;;  %v2545_v47 = vmul.f32 %v2504_v40, %v339_v36  ;;  %v379_v20 = vsel %vm223_vm0, %v2542_v46, -inf }
  0xff   : > { %v1685_v54 = vpop.f32.mrf.mxu1  ;;  %v2527_v31 = vmul.f32 %v2499_v26, %v935_v37  ;;  %v975_v48 = vsel %vm223_vm0, %v2513_v49, -inf }
 0x100   : > { %v1773_v21 = vpop.f32.mrf.mxu0  ;;  %v2524_v30 = vmul.f32 %v2504_v40, %v1685_v54  ;;  %v378_v5 = vsel %vm223_vm0, %v2545_v47, -inf }
 0x101   : > { %v2516_v24 = vmul.f32 %v2499_v26, %v1773_v21  ;;  %v349_v33 = vpop.f32.mrf.mxu1  ;;  %v974_v58 = vsel %vm223_vm0, %v2527_v31, -inf }
 0x102   : > { %v945_v34 = vpop.f32.mrf.mxu0  ;;  %v2532_v39 = vmul.f32 %v2504_v40, %v349_v33  ;;  %v382_v57 = vsel %vm223_vm0, %v2524_v30, -inf }
 0x103   : > { %v978_v42 = vsel %vm223_vm0, %v2516_v24, -inf  ;;  %v2537_v43 = vmul.f32 %v2499_v26, %v945_v34  ;;  %v1688_v50 = vpop.f32.mrf.mxu1  ;;  %v383_v6 = vmax.f32 %v377_v19, %v382_v57 }
 0x104   : > { %v1776_v51 = vpop.f32.mrf.mxu0  ;;  %v380_v52 = vsel %vm223_vm0, %v2532_v39, -inf  ;;  %v2552_v53 = vmul.f32 %v2504_v40, %v1688_v50  ;;  %v979_v59 = vmax.f32 %v973_v29, %v978_v42 }
 0x105   : > { %v976_v55 = vsel %vm223_vm0, %v2537_v43, -inf  ;;  %v2557_v56 = vmul.f32 %v2499_v26, %v1776_v51  ;;  %v359_v60 = vpop.f32.mrf.mxu1  ;;  %v381_v2 = vmax.f32 %v376_v44, %v380_v52 }
 0x106   : > { %v977_v1 = vmax.f32 %v972_v38, %v976_v55  ;;  %v955_v61 = vpop.f32.mrf.mxu0  ;;  %v386_v3 = vsel %vm223_vm0, %v2552_v53, -inf  ;;  %v2566_v62 = vmul.f32 %v2504_v40, %v359_v60 }
 0x107   : > { %v982_v63 = vsel %vm223_vm0, %v2557_v56, -inf  ;;  %v970_v0 = vmul.f32 %v2499_v26, %v955_v61  ;;  %v387_v9 = vmax.f32 %v379_v20, %v386_v3  ;;  %v388_v14 = vmax.f32 %v381_v2, %v383_v6 }
 0x108   : > { %v983_v4 = vmax.f32 %v975_v48, %v982_v63  ;;  %v384_v7 = vsel %vm223_vm0, %v2566_v62, -inf  ;;  %v984_v10 = vmax.f32 %v977_v1, %v979_v59 }
 0x109   : > { %v980_v8 = vsel %vm223_vm0, %v970_v0, -inf  ;;  %v385_v11 = vmax.f32 %v378_v5, %v384_v7 }
 0x10a   : > { %v981_v12 = vmax.f32 %v974_v58, %v980_v8 }
 0x10b   : > { %v389_v15 = vmax.f32 %v385_v11, %v387_v9 }
 0x10c   : > { %v985_v16 = vmax.f32 %v981_v12, %v983_v4 }
 0x10d   : > { %v390_v17 = vmax.f32 %v388_v14, %v389_v15 }
 0x10e   : > { %v986_v18 = vmax.f32 %v984_v10, %v985_v16 }
 0x10f   : > { %v391_v13 = vrot.slane %v390_v17, 4 }
 0x110   : > { %v987_v22 = vrot.slane %v986_v18, 4 }
 0x111   : > { %v392_v23 = vmax.f32 %v390_v17, %v391_v13 }
 0x112   : > { %v988_v25 = vmax.f32 %v986_v18, %v987_v22 }
 0x113   : > { %v393_v27 = vrot.slane %v392_v23, 2 }
 0x114   : > { %v989_v32 = vrot.slane %v988_v25, 2 }
 0x115   : > { %v394_v36 = vmax.f32 %v392_v23, %v393_v27 }
 0x116   : > { %v990_v37 = vmax.f32 %v988_v25, %v989_v32 }
 0x117   : > { %v395_v54 = vrot.slane %v394_v36, 1 }
 0x118   : > { %v991_v21 = vrot.slane %v990_v37, 1 }
 0x119   : > { %v396_v29 = vmax.f32 %v394_v36, %v395_v54 }
 0x11a   : > { %v992_v33 = vmax.f32 %v990_v37, %v991_v21 }
 0x11b   : > { %v397_v34 = vsub.f32 %v2510_v45, %v396_v29  ;;  %v398_v38 = vsub.f32 %v2519_v28, %v396_v29  ;;  %v400_v45 = vsub.f32 %v2542_v46, %v396_v29  ;;  %v402_v46 = vsub.f32 %v2524_v30, %v396_v29 }
 0x11c   : > { %v993_v42 = vsub.f32 %v2507_v41, %v992_v33  ;;  %v994_v44 = vsub.f32 %v2502_v35, %v992_v33  ;;  %v995_v50 = vsub.f32 %v2527_v31, %v992_v33  ;;  %v996_v52 = vsub.f32 %v2513_v49, %v992_v33 }
 0x11d   : > { %v405_v48 = vmul.f32 1.442695, %v397_v34  ;;  %v407_v51 = vmul.f32 1.442695, %v398_v38  ;;  %v997_v55 = vsub.f32 %v2537_v43, %v992_v33  ;;  %v998_v58 = vsub.f32 %v2516_v24, %v992_v33 }
 0x11e   : > { %v1001_v57 = vmul.f32 1.442695, %v993_v42  ;;  %v1003_v59 = vmul.f32 1.442695, %v994_v44  ;;  %v1005_v28 = vmul.f32 1.442695, %v995_v50  ;;  %v999_v41 = vsub.f32 %v970_v0, %v992_v33 }
 0x11f   : > { %1875 = vpow2.f32 %v405_v48  ;;  %v1007_v1 = vmul.f32 1.442695, %v996_v52  ;;  %v1009_v35 = vmul.f32 1.442695, %v997_v55  ;;  %v399_v31 = vsub.f32 %v2545_v47, %v396_v29 }
 0x120   : > { %1877 = vpow2.f32 %v407_v51  ;;  %v1000_v60 = vsub.f32 %v2557_v56, %v992_v33  ;;  %v1011_v49 = vmul.f32 1.442695, %v998_v58  ;;  %v401_v43 = vsub.f32 %v2532_v39, %v396_v29 }
 0x121   : > { %1879 = vpow2.f32 %v1001_v57  ;;  %v411_v61 = vmul.f32 1.442695, %v400_v45  ;;  %v1013_v24 = vmul.f32 1.442695, %v999_v41  ;;  %v409_v3 = vmul.f32 1.442695, %v399_v31 }
 0x122   : > { %1881 = vpow2.f32 %v1003_v59  ;;  %v1015_v63 = vmul.f32 1.442695, %v1000_v60  ;;  %v403_v0 = vsub.f32 %v2566_v62, %v396_v29  ;;  %v413_v47 = vmul.f32 1.442695, %v401_v43 }
 0x123   : > { %1883 = vpow2.f32 %v1005_v28  ;;  %v404_v56 = vsub.f32 %v2552_v53, %v396_v29  ;;  %v415_v19 = vmul.f32 1.442695, %v402_v46 }
 0x124   : > { %1885 = vpow2.f32 %v1007_v1  ;;  %v417_v39 = vmul.f32 1.442695, %v403_v0 }
 0x125   : > { %1887 = vpow2.f32 %v1009_v35  ;;  %v419_v2 = vmul.f32 1.442695, %v404_v56 }
 0x126   : > { %1889 = vpow2.f32 %v1011_v49 }
 0x127   : > { %1891 = vpow2.f32 %v411_v61 }
 0x128   : > { %1893 = vpow2.f32 %v1013_v24 }
 0x129   : > { %1895 = vpow2.f32 %v409_v3 }
 0x12a   : > { %1897 = vpow2.f32 %v1015_v63 }
 0x12b   : > { %1899 = vpow2.f32 %v413_v47 }
 0x12c   : > { %v2595_v20 = vpop.eup %1875  ;;  %1901 = vpow2.f32 %v415_v19 }
 0x12d   : > { %v2597_v30 = vpop.eup %1877  ;;  %1903 = vpow2.f32 %v417_v39  ;;  %v421_v10 = vsel %vm223_vm0, %v2595_v20, 0.0 }
 0x12e   : > { %v1880_v4 = vpop.eup %1879  ;;  %1905 = vpow2.f32 %v419_v2  ;;  %v422_v11 = vsel %vm223_vm0, %v2597_v30, 0.0 }
 0x12f   : > { %v1882_v5 = vpop.eup %1881  ;;  %v1017_v62 = vsel %vm223_vm0, %v1880_v4, 0.0  ;;  %v423_v13 = vadd.f32 %v422_v11, %v421_v10 }
 0x130   : > { %v1884_v6 = vpop.eup %1883  ;;  %v1018_v53 = vsel %vm223_vm0, %v1882_v5, 0.0 }
 0x131   : > { %v1886_v7 = vpop.eup %1885  ;;  %v1019_v8 = vadd.f32 %v1018_v53, %v1017_v62  ;;  %v1020_v9 = vsel %vm223_vm0, %v1884_v6, 0.0 }
 0x132   : > { %v1888_v12 = vpop.eup %1887  ;;  %v1022_v14 = vsel %vm223_vm0, %v1886_v7, 0.0 }
 0x133   : > { %v1890_v15 = vpop.eup %1889  ;;  %v1021_v16 = vadd.f32 %v1020_v9, %v1019_v8  ;;  %v1024_v18 = vsel %vm223_vm0, %v1888_v12, 0.0 }
 0x134   : > { %v2607_v17 = vpop.eup %1891  ;;  %v1026_v27 = vsel %vm223_vm0, %v1890_v15, 0.0 }
 0x135   : > { %v1894_v22 = vpop.eup %1893  ;;  %v1023_v23 = vadd.f32 %v1022_v14, %v1021_v16  ;;  %v426_v34 = vsel %vm223_vm0, %v2607_v17, 0.0 }
 0x136   : > { %v1896_v25 = vpop.eup %1895  ;;  %v1028_v21 = vsel %vm223_vm0, %v1894_v22, 0.0 }
 0x137   : > { %v2611_v32 = vpop.eup %1897  ;;  %v1025_v36 = vadd.f32 %v1024_v18, %v1023_v23  ;;  %v424_v37 = vsel %vm223_vm0, %v1896_v25, 0.0 }
 0x138   : > { %v2614_v54 = vpop.eup %1899  ;;  %v425_v29 = vadd.f32 %v424_v37, %v423_v13  ;;  %v1030_v42 = vsel %vm223_vm0, %v2611_v32, 0.0 }
 0x139   : > { %v1027_v33 = vadd.f32 %v1026_v27, %v1025_v36  ;;  %v2619_v38 = vpop.eup %1901  ;;  %v428_v50 = vsel %vm223_vm0, %v2614_v54, 0.0 }
 0x13a   : > { %v427_v44 = vadd.f32 %v426_v34, %v425_v29  ;;  %v2625_v51 = vpop.eup %1903  ;;  %v430_v58 = vsel %vm223_vm0, %v2619_v38, 0.0 }
 0x13b   : > { %v1029_v48 = vadd.f32 %v1028_v21, %v1027_v33  ;;  %v2627_v55 = vpop.eup %1905  ;;  %v432_v45 = vsel %vm223_vm0, %v2625_v51, 0.0 }
 0x13c   : > { %v429_v52 = vadd.f32 %v428_v50, %v427_v44  ;;  %v434_v35 = vsel %vm223_vm0, %v2627_v55, 0.0 }
 0x13d   : > { %v1031_v57 = vadd.f32 %v1030_v42, %v1029_v48 }
 0x13e   : > { %v431_v59 = vadd.f32 %v430_v58, %v429_v52 }
 0x13f   : > { %v1032_v28 = vrot.slane %v1031_v57, 4 }
 0x140   : > { %v433_v41 = vadd.f32 %v432_v45, %v431_v59 }
 0x141   : > { %v1033_v1 = vadd.f32 %v1032_v28, %v1031_v57 }
 0x142   : > { %v435_v31 = vadd.f32 %v434_v35, %v433_v41 }
 0x143   : > { %v1034_v60 = vrot.slane %v1033_v1, 2 }
 0x144   : > { %v436_v49 = vrot.slane %v435_v31, 4 }
 0x145   : > { %v1035_v43 = vadd.f32 %v1034_v60, %v1033_v1  ;;  %v184_v60 = vld [vmem:[%s3002_s2 + $0x8] sm:$0xff] }
 0x146   : > { %v437_v61 = vadd.f32 %v436_v49, %v435_v31  ;;  %v183_v49 = vld [vmem:[%s3002_s2] sm:$0xff] }
 0x147   : > { %v1036_v24 = vrot.slane %v1035_v43, 1 }
 0x148   : > { %v438_v46 = vrot.slane %v437_v61, 2 }
 0x149   : > { %v1037_v3 = vadd.f32 %v1036_v24, %v1035_v43 }
 0x14a   : > { %v439_v63 = vadd.f32 %v438_v46, %v437_v61 }
 0x14b   : > { %1907 = vrcp.f32 %v1037_v3 }
 0x14c   : > { %v440_v0 = vrot.slane %v439_v63, 1 }
 0x14e   : > { %v441_v47 = vadd.f32 %v440_v0, %v439_v63 }
 0x150   : > { %1909 = vrcp.f32 %v441_v47  ;;  %v185_v47 = vld [vmem:[%s3002_s2 + $0x10] sm:$0xff] }
 0x158   : > { %v1908_v56 = vpop.eup %1907 }
 0x159   : > { %v2635_v19 = vmul.f32 %v1908_v56, %v1880_v4  ;;  %v2637_v39 = vmul.f32 %v1908_v56, %v1882_v5  ;;  %v2639_v2 = vmul.f32 %v1908_v56, %v1884_v6  ;;  %v2641_v62 = vmul.f32 %v1908_v56, %v1886_v7 }
 0x15a   : > { %v2649_v10 = vmul.f32 %v1908_v56, %v1888_v12  ;;  %v2652_v4 = vmul.f32 %v1908_v56, %v1890_v15  ;;  %v1046_v16 = vmul.f32 %v1908_v56, %v1894_v22  ;;  %v2668_v23 = vmul.f32 %v1908_v56, %v2611_v32 }
 0x15b   : > { %v1072_v53 = vmul.f32 %v2499_v26, %v2635_v19  ;;  %v1073_v8 = vmul.f32 %v2499_v26, %v2637_v39  ;;  %v1074_v9 = vmul.f32 %v2499_v26, %v2639_v2  ;;  %v1075_v14 = vmul.f32 %v2499_v26, %v2641_v62 }
 0x15c   : > { %v1076_v12 = vmul.f32 %v2499_v26, %v2649_v10  ;;  %v1077_v27 = vmul.f32 %v2499_v26, %v2652_v4  ;;  %v1079_v33 = vmul.f32 %v2499_v26, %v2668_v23  ;;  %v1051_v52 = vsel %vm223_vm0, %v2637_v39, 0.0 }
 0x15d   : > { %v1910_v11 = vpop.eup %1909  ;;  %1809 = vmatprep.mubr.msk.f32.mxu0 %vm223_vm0, %v1072_v53  ;;  %v1057_v57 = vsel %vm223_vm0, %v2641_v62, 0.0  ;;  %v1054_v58 = vsel %vm223_vm0, %v2639_v2, 0.0  ;;  %v1060_v59 = vsel %vm223_vm0, %v2649_v10, 0.0  ;;  %v1066_v45 = vsel %vm223_vm0, %v1046_v16, 0.0  ;;  %v186_v53 = vld [vmem:[%s3002_s2 + $0x18] sm:$0xff] }
 0x15e   : > { %v446_v5 = vmul.f32 %v1910_v11, %v1896_v25  ;;  %v444_v6 = vmul.f32 %v1910_v11, %v2595_v20  ;;  %v445_v7 = vmul.f32 %v1910_v11, %v2597_v30  ;;  %1810 = vmatmul.mubr.msk.f32.vlgmr.msra.gmra.mxu0 %vm223_vm0, %v1073_v8  ;;  %v447_v20 = vmul.f32 %v1910_v11, %v2607_v17 }
 0x15f   : > { %1812 = vmatprep.mubr.msk.f32.mxu0 %vm223_vm0, %v1074_v9  ;;  %v448_v22 = vmul.f32 %v1910_v11, %v2614_v54  ;;  %v1078_v17 = vmul.f32 %v2499_v26, %v1046_v16  ;;  %v449_v37 = vmul.f32 %v1910_v11, %v2619_v38  ;;  %v450_v29 = vmul.f32 %v1910_v11, %v2625_v51 }
 0x160   : > { %v458_v18 = vsel %vm223_vm0, %v446_v5, 0.0  ;;  %v452_v15 = vsel %vm223_vm0, %v444_v6, 0.0  ;;  %v476_v13 = vmul.f32 %v2504_v40, %v444_v6  ;;  %v477_v30 = vmul.f32 %v2504_v40, %v445_v7 }
 0x161   : > { %459 = vadd.xlane.f32.xlu1 %v458_v18  ;;  %453 = vadd.xlane.f32.xlu0 %v452_v15  ;;  %v478_v25 = vmul.f32 %v2504_v40, %v446_v5  ;;  %v461_v32 = vsel %vm223_vm0, %v447_v20, 0.0  ;;  %v455_v36 = vsel %vm223_vm0, %v445_v7, 0.0  ;;  %v479_v54 = vmul.f32 %v2504_v40, %v447_v20  ;;  %v189_v15 = vld [vmem:[%s3002_s2 + $0x30] sm:$0xff] }
 0x162   : > { %1721 = vmatprep.mubr.msk.f32.mxu1 %vm223_vm0, %v476_v13  ;;  %1813 = vmatmul.mubr.msk.f32.gmra.mxu0 %vm223_vm0, %v1075_v14  ;;  %v480_v21 = vmul.f32 %v2504_v40, %v448_v22  ;;  %v467_v34 = vsel %vm223_vm0, %v449_v37, 0.0  ;;  %v464_v38 = vsel %vm223_vm0, %v448_v22, 0.0  ;;  %v451_v42 = vmul.f32 %v1910_v11, %v2627_v55 }
 0x163   : > { %1722 = vmatmul.mubr.msk.f32.vlgmr.msra.gmra.mxu1 %vm223_vm0, %v477_v30  ;;  %1815 = vmatprep.mubr.msk.f32.mxu0 %vm223_vm0, %v1076_v12  ;;  %v481_v44 = vmul.f32 %v2504_v40, %v449_v37  ;;  %v482_v48 = vmul.f32 %v2504_v40, %v450_v29  ;;  %v470_v50 = vsel %vm223_vm0, %v450_v29, 0.0  ;;  %v1048_v55 = vsel %vm223_vm0, %v2635_v19, 0.0  ;;  %v188_v12 = vld [vmem:[%s3002_s2 + $0x28] sm:$0xff]  ;;  %v2761_v37 = vld [vmem:[%s3002_s2 + $0x38] sm:$0xff] }
 0x164   : > { %1724 = vmatprep.mubr.msk.f32.mxu1 %vm223_vm0, %v478_v25  ;;  %v473_v26 = vsel %vm223_vm0, %v451_v42, 0.0  ;;  %v483_v51 = vmul.f32 %v2504_v40, %v451_v42  ;;  %v1063_v40 = vsel %vm223_vm0, %v2652_v4, 0.0  ;;  %v187_v4 = vld [vmem:[%s3002_s2 + $0x20] sm:$0xff] }
 0x165   : > { %462 = vadd.xlane.f32.xlu1 %v461_v32  ;;  %456 = vadd.xlane.f32.xlu0 %v455_v36 }
 0x166   : > { %1816 = vmatmul.mubr.msk.f32.gmra.mxu0 %vm223_vm0, %v1077_v27 }
 0x167   : > { %1725 = vmatmul.mubr.msk.f32.gmra.mxu1 %vm223_vm0, %v479_v54  ;;  %1818 = vmatprep.mubr.msk.f32.mxu0 %vm223_vm0, %v1078_v17  ;;  %v1069_v17 = vsel %vm223_vm0, %v2668_v23, 0.0 }
 0x168   : > { %1727 = vmatprep.mubr.msk.f32.mxu1 %vm223_vm0, %v480_v21 }
 0x169   : > { %468 = vadd.xlane.f32.xlu1 %v467_v34  ;;  %465 = vadd.xlane.f32.xlu0 %v464_v38 }
 0x16a   : > { %1819 = vmatmul.mubr.msk.f32.gmra.mxu0 %vm223_vm0, %v1079_v33 }
 0x16b   : > { %1728 = vmatmul.mubr.msk.f32.gmra.mxu1 %vm223_vm0, %v481_v44 }
 0x16c   : > { %1730 = vmatprep.mubr.msk.f32.mxu1 %vm223_vm0, %v482_v48 }
 0x16d   : > { %474 = vadd.xlane.f32.xlu1 %v473_v26  ;;  %471 = vadd.xlane.f32.xlu0 %v470_v50 }
 0x16f   : > { %1731 = vmatmul.mubr.msk.f32.gmra.mxu1 %vm223_vm0, %v483_v51 }
 0x171   : > { %1052 = vadd.xlane.f32.xlu1 %v1051_v52  ;;  %1049 = vadd.xlane.f32.xlu0 %v1048_v55 }
 0x175   : > { %1058 = vadd.xlane.f32.xlu1 %v1057_v57  ;;  %1055 = vadd.xlane.f32.xlu0 %v1054_v58 }
 0x179   : > { %1064 = vadd.xlane.f32.xlu1 %v1063_v40  ;;  %1061 = vadd.xlane.f32.xlu0 %v1060_v59 }
 0x17d   : > { %1067 = vadd.xlane.f32.xlu0 %v1066_v45 }
 0x1ea   : > { %v454_v28 = vpop.xlane.xlu0 %453  ;;  %v460_v41 = vpop.xlane.xlu1 %459 }
 0x1eb   : > { %v661_v63 = vmul.f32 %v454_v28, %v183_v49  ;;  %v663_v9 = vmul.f32 %v460_v41, %v185_v47 }
 0x1ee   : > { %v457_v1 = vpop.xlane.xlu0 %456  ;;  %v463_v35 = vpop.xlane.xlu1 %462 }
 0x1ef   : > { %v662_v61 = vmul.f32 %v457_v1, %v184_v60  ;;  %v664_v7 = vmul.f32 %v463_v35, %v186_v53 }
 0x1f2   : > { %v466_v31 = vpop.xlane.xlu0 %465  ;;  %v469_v24 = vpop.xlane.xlu1 %468 }
 0x1f3   : > { %v665_v18 = vmul.f32 %v466_v31, %v187_v4  ;;  %v666_v32 = vmul.f32 %v469_v24, %v188_v12 }
 0x1f6   : > { %v472_v46 = vpop.xlane.xlu0 %471  ;;  %v475_v10 = vpop.xlane.xlu1 %474 }
 0x1f7   : > { %v667_v54 = vmul.f32 %v472_v46, %v189_v15  ;;  %v668_v44 = vmul.f32 %v475_v10, %v2761_v37 }
 0x1fa   : > { %v1050_v2 = vpop.xlane.xlu0 %1049  ;;  %v1053_v13 = vpop.xlane.xlu1 %1052 }
 0x1fb   : > { %v1257_v29 = vmul.f32 %v1050_v2, %v183_v49  ;;  %v1258_v51 = vmul.f32 %v1053_v13, %v184_v60 }
 0x1fe   : > { %v1056_v30 = vpop.xlane.xlu0 %1055  ;;  %v1059_v48 = vpop.xlane.xlu1 %1058 }
 0x1ff   : > { %v1259_v52 = vmul.f32 %v1056_v30, %v185_v47  ;;  %v1260_v45 = vmul.f32 %v1059_v48, %v186_v53 }
 0x202   : > { %v1062_v26 = vpop.xlane.xlu0 %1061  ;;  %v1065_v35 = vpop.xlane.xlu1 %1064 }
 0x203   : > { %v1261_v28 = vmul.f32 %v1062_v26, %v187_v4  ;;  %v1262_v24 = vmul.f32 %v1065_v35, %v188_v12 }
 0x206   : > { %v1068_v31 = vpop.xlane.xlu0 %1067 }
 0x207   : > { %v1263_v46 = vmul.f32 %v1068_v31, %v189_v15 }
 0x21e   : > { %v2723_v43 = vpop.f32.mrf.mxu0 }
 0x21f   : > { %v2781_v41 = vsub.f32 %v2723_v43, %v1258_v51 }
 0x220   : > { %v1218_v19 = vpop.f32.mrf.mxu0 }
 0x221   : > { %v2772_v55 = vsub.f32 %v1218_v19, %v1257_v29  ;;  %v1274_v43 = vmul.f32 %v2781_v41, %v2781_v41 }
 0x222   : > { %v1814_v6 = vpop.f32.mrf.mxu0 }
 0x223   : > { %v1723_v3 = vpop.f32.mrf.mxu1  ;;  %v1273_v49 = vmul.f32 %v2772_v55, %v2772_v55 }
 0x224   : > { %v2725_v0 = vsub.f32 %v1723_v3, %v662_v61  ;;  %v1228_v22 = vpop.f32.mrf.mxu0  ;;  %v2789_v3 = vsub.f32 %v1814_v6, %v1260_v45 }
 0x225   : > { %v622_v56 = vpop.f32.mrf.mxu1  ;;  %v2783_v1 = vsub.f32 %v1228_v22, %v1259_v52 }
 0x226   : > { %v2730_v39 = vsub.f32 %v622_v56, %v661_v63  ;;  %v678_v62 = vmul.f32 %v2725_v0, %v2725_v0  ;;  %v1817_v38 = vpop.f32.mrf.mxu0 }
 0x227   : > { %v1726_v8 = vpop.f32.mrf.mxu1  ;;  %v1275_v47 = vmul.f32 %v2783_v1, %v2783_v1  ;;  %v2797_v19 = vsub.f32 %v1817_v38, %v1262_v24 }
 0x228   : > { %687 = vadd.xlane.f32.xlu1 %v678_v62  ;;  %v677_v11 = vmul.f32 %v2730_v39, %v2730_v39  ;;  %v2750_v20 = vsub.f32 %v1726_v8, %v664_v7  ;;  %v1238_v59 = vpop.f32.mrf.mxu0  ;;  %v1276_v62 = vmul.f32 %v2789_v3, %v2789_v3 }
 0x229   : > { %v632_v5 = vpop.f32.mrf.mxu1  ;;  %v2791_v63 = vsub.f32 %v1238_v59, %v1261_v28  ;;  %v1278_v8 = vmul.f32 %v2797_v19, %v2797_v19 }
 0x22a   : > { %v2742_v14 = vsub.f32 %v632_v5, %v663_v9  ;;  %685 = vadd.xlane.f32.xlu0 %v677_v11  ;;  %v680_v34 = vmul.f32 %v2750_v20, %v2750_v20  ;;  %v1820_v61 = vpop.f32.mrf.mxu0 }
 0x22b   : > { %v1729_v16 = vpop.f32.mrf.mxu1  ;;  %v1277_v53 = vmul.f32 %v2791_v63, %v2791_v63 }
 0x22c   : > { %v679_v25 = vmul.f32 %v2742_v14, %v2742_v14  ;;  %v2763_v33 = vsub.f32 %v1729_v16, %v666_v32  ;;  %v1248_v56 = vpop.f32.mrf.mxu0 }
 0x22d   : > { %v642_v27 = vpop.f32.mrf.mxu1  ;;  %v2799_v2 = vsub.f32 %v1248_v56, %v1263_v46 }
 0x22e   : > { %v2756_v36 = vsub.f32 %v642_v27, %v665_v18  ;;  %1070 = vadd.xlane.f32.xlu0 %v1069_v17  ;;  %689 = vadd.xlane.f32.xlu1 %v679_v25  ;;  %v682_v58 = vmul.f32 %v2763_v33, %v2763_v33 }
 0x22f   : > { %v1732_v21 = vpop.f32.mrf.mxu1  ;;  %v1279_v9 = vmul.f32 %v2799_v2, %v2799_v2 }
 0x230   : > { %v681_v23 = vmul.f32 %v2756_v36, %v2756_v36  ;;  %v2774_v57 = vsub.f32 %v1732_v21, %v668_v44 }
 0x231   : > { %v652_v42 = vpop.f32.mrf.mxu1 }
 0x232   : > { %v2770_v50 = vsub.f32 %v652_v42, %v667_v54  ;;  %691 = vadd.xlane.f32.xlu1 %v680_v34  ;;  %693 = vadd.xlane.f32.xlu0 %v681_v23  ;;  %v684_v60 = vmul.f32 %v2774_v57, %v2774_v57 }
 0x234   : > { %v683_v40 = vmul.f32 %v2770_v50, %v2770_v50 }
 0x236   : > { %695 = vadd.xlane.f32.xlu1 %v682_v58  ;;  %697 = vadd.xlane.f32.xlu0 %v683_v40 }
 0x23a   : > { %699 = vadd.xlane.f32.xlu1 %v684_v60  ;;  %1281 = vadd.xlane.f32.xlu0 %v1273_v49 }
 0x23e   : > { %1283 = vadd.xlane.f32.xlu1 %v1274_v43  ;;  %1285 = vadd.xlane.f32.xlu0 %v1275_v47 }
 0x242   : > { %1287 = vadd.xlane.f32.xlu1 %v1276_v62  ;;  %1289 = vadd.xlane.f32.xlu0 %v1277_v53 }
 0x246   : > { %1291 = vadd.xlane.f32.xlu1 %v1278_v8  ;;  %1293 = vadd.xlane.f32.xlu0 %v1279_v9 }
 0x2b1   : > { %v688_v10 = vpop.xlane.xlu1 %687 }
 0x2b2   : > { %v702_v11 = vmax.f32 %v688_v10, 1e-24 }
 0x2b3   : > { %v686_v4 = vpop.xlane.xlu0 %685 }
 0x2b4   : > { %1911 = vrsqrt.f32 %v702_v11  ;;  %v701_v5 = vmax.f32 %v686_v4, 1e-24 }
 0x2b6   : > { %1913 = vrsqrt.f32 %v701_v5 }
 0x2b7   : > { %v690_v6 = vpop.xlane.xlu1 %689  ;;  %v1071_v7 = vpop.xlane.xlu0 %1070 }
 0x2b8   : > { %v703_v12 = vmax.f32 %v690_v6, 1e-24  ;;  %v1264_v16 = vmul.f32 %v1071_v7, %v2761_v37 }
 0x2ba   : > { %1915 = vrsqrt.f32 %v703_v12  ;;  %v2810_v18 = vsub.f32 %v1820_v61, %v1264_v16 }
 0x2bb   : > { %v692_v15 = vpop.xlane.xlu1 %691  ;;  %v694_v13 = vpop.xlane.xlu0 %693 }
 0x2bc   : > { %v704_v30 = vmax.f32 %v692_v15, 1e-24  ;;  %v705_v25 = vmax.f32 %v694_v13, 1e-24  ;;  %v1280_v22 = vmul.f32 %v2810_v18, %v2810_v18 }
 0x2be   : > { %1917 = vrsqrt.f32 %v704_v30  ;;  %1295 = vadd.xlane.f32.xlu1 %v1280_v22 }
 0x2bf   : > { %1919 = vrsqrt.f32 %v705_v25  ;;  %v696_v27 = vpop.xlane.xlu1 %695  ;;  %v698_v17 = vpop.xlane.xlu0 %697 }
 0x2c0   : > { %v706_v32 = vmax.f32 %v696_v27, 1e-24  ;;  %v707_v54 = vmax.f32 %v698_v17, 1e-24 }
 0x2c1   : > { %v2814_v21 = vpop.eup %1911 }
 0x2c2   : > { %1921 = vrsqrt.f32 %v706_v32  ;;  %v718_v34 = vmul.f32 %v2814_v21, %v2814_v21 }
 0x2c3   : > { %v2816_v37 = vpop.eup %1913  ;;  %1923 = vrsqrt.f32 %v707_v54  ;;  %v700_v29 = vpop.xlane.xlu1 %699 }
 0x2c4   : > { %v717_v23 = vmul.f32 %v2816_v37, %v2816_v37  ;;  %v708_v38 = vmax.f32 %v700_v29, 1e-24  ;;  %v726_v48 = vmul.f32 %v718_v34, %v688_v10  ;;  %v1282_v30 = vpop.xlane.xlu0 %1281 }
 0x2c6   : > { %v725_v42 = vmul.f32 %v717_v23, %v686_v4  ;;  %1925 = vrsqrt.f32 %v708_v38  ;;  %v735_v59 = vsel %vm733_vm1, %v726_v48, 0.0 }
 0x2c7   : > { %v2822_v44 = vpop.eup %1915  ;;  %v1284_v25 = vpop.xlane.xlu1 %1283 }
 0x2c8   : > { %v719_v26 = vmul.f32 %v2822_v44, %v2822_v44  ;;  %v734_v51 = vsel %vm733_vm1, %v725_v42, 0.0  ;;  %v1298_v22 = vmax.f32 %v1284_v25, 1e-24  ;;  %v1286_v32 = vpop.xlane.xlu0 %1285 }
 0x2c9   : > { %v736_v35 = vadd.f32 %v735_v59, %v734_v51  ;;  %v1299_v54 = vmax.f32 %v1286_v32, 1e-24 }
 0x2ca   : > { %v727_v52 = vmul.f32 %v719_v26, %v690_v6  ;;  %1927 = vrsqrt.f32 %v1298_v22 }
 0x2cb   : > { %v2827_v58 = vpop.eup %1917 }
 0x2cc   : > { %v2829_v40 = vpop.eup %1919  ;;  %v737_v45 = vsel %vm733_vm1, %v727_v52, 0.0  ;;  %v720_v28 = vmul.f32 %v2827_v58, %v2827_v58  ;;  %v1290_v23 = vpop.xlane.xlu0 %1289 }
 0x2cd   : > { %v721_v31 = vmul.f32 %v2829_v40, %v2829_v40  ;;  %v738_v61 = vadd.f32 %v737_v45, %v736_v35 }
 0x2ce   : > { %v728_v60 = vmul.f32 %v720_v28, %v692_v15 }
 0x2cf   : > { %v2837_v49 = vpop.eup %1921  ;;  %v729_v24 = vmul.f32 %v721_v31, %v694_v13 }
 0x2d0   : > { %v2839_v46 = vpop.eup %1923  ;;  %v739_v43 = vsel %vm733_vm1, %v728_v60, 0.0  ;;  %v722_v47 = vmul.f32 %v2837_v49, %v2837_v49  ;;  %v1294_v51 = vpop.xlane.xlu0 %1293 }
 0x2d1   : > { %v740_v56 = vadd.f32 %v739_v43, %v738_v61  ;;  %v723_v62 = vmul.f32 %v2839_v46, %v2839_v46  ;;  %v741_v53 = vsel %vm733_vm1, %v729_v24, 0.0  ;;  %v1303_v45 = vmax.f32 %v1294_v51, 1e-24 }
 0x2d2   : > { %v730_v8 = vmul.f32 %v722_v47, %v696_v27  ;;  %v1297_v27 = vmax.f32 %v1282_v30, 1e-24 }
 0x2d3   : > { %v2847_v9 = vpop.eup %1925  ;;  %v742_v10 = vadd.f32 %v741_v53, %v740_v56  ;;  %v731_v11 = vmul.f32 %v723_v62, %v698_v17  ;;  %v1288_v17 = vpop.xlane.xlu1 %1287 }
 0x2d4   : > { %v743_v4 = vsel %vm733_vm1, %v730_v8, 0.0  ;;  %v724_v5 = vmul.f32 %v2847_v9, %v2847_v9  ;;  %1929 = vrsqrt.f32 %v1297_v27  ;;  %v1300_v34 = vmax.f32 %v1288_v17, 1e-24 }
 0x2d5   : > { %v744_v6 = vadd.f32 %v743_v4, %v742_v10  ;;  %v745_v7 = vsel %vm733_vm1, %v731_v11, 0.0  ;;  %1931 = vrsqrt.f32 %v1299_v54 }
 0x2d6   : > { %v732_v12 = vmul.f32 %v724_v5, %v700_v29  ;;  %1933 = vrsqrt.f32 %v1300_v34  ;;  %v1301_v29 = vmax.f32 %v1290_v23, 1e-24 }
 0x2d7   : > { %v746_v16 = vadd.f32 %v745_v7, %v744_v6  ;;  %v1292_v38 = vpop.xlane.xlu1 %1291  ;;  %v2854_v48 = vpop.eup %1927 }
 0x2d8   : > { %v747_v15 = vsel %vm733_vm1, %v732_v12, 0.0  ;;  %v1302_v42 = vmax.f32 %v1292_v38, 1e-24  ;;  %1935 = vrsqrt.f32 %v1301_v29  ;;  %v1314_v52 = vmul.f32 %v2854_v48, %v2854_v48 }
 0x2d9   : > { %v748_v13 = vadd.f32 %v747_v15, %v746_v16 }
 0x2da   : > { %1937 = vrsqrt.f32 %v1302_v42  ;;  %v1322_v35 = vmul.f32 %v1314_v52, %v1284_v25 }
 0x2db   : > { %749 = vadd.xlane.f32.xlu0 %v748_v13  ;;  %1939 = vrsqrt.f32 %v1303_v45 }
 0x2dc   : > { %v1330_v24 = vsel %vm733_vm1, %v1322_v35, 0.0 }
 0x2e1   : > { %v2856_v26 = vpop.eup %1929 }
 0x2e2   : > { %v1313_v59 = vmul.f32 %v2856_v26, %v2856_v26  ;;  %v2862_v28 = vpop.eup %1931 }
 0x2e3   : > { %v2864_v31 = vpop.eup %1933  ;;  %v1315_v61 = vmul.f32 %v2862_v28, %v2862_v28 }
 0x2e4   : > { %v1321_v60 = vmul.f32 %v1313_v59, %v1282_v30  ;;  %v1316_v43 = vmul.f32 %v2864_v31, %v2864_v31 }
 0x2e5   : > { %v1323_v56 = vmul.f32 %v1315_v61, %v1286_v32  ;;  %v2872_v62 = vpop.eup %1935 }
 0x2e6   : > { %v1329_v47 = vsel %vm733_vm1, %v1321_v60, 0.0  ;;  %v1324_v10 = vmul.f32 %v1316_v43, %v1288_v17  ;;  %v1317_v6 = vmul.f32 %v2872_v62, %v2872_v62 }
 0x2e7   : > { %v1331_v53 = vadd.f32 %v1330_v24, %v1329_v47  ;;  %v2874_v4 = vpop.eup %1937  ;;  %v1332_v5 = vsel %vm733_vm1, %v1323_v56, 0.0 }
 0x2e8   : > { %v1334_v12 = vsel %vm733_vm1, %v1324_v10, 0.0  ;;  %v1318_v16 = vmul.f32 %v2874_v4, %v2874_v4  ;;  %v1325_v15 = vmul.f32 %v1317_v6, %v1290_v23  ;;  %v2882_v13 = vpop.eup %1939 }
 0x2e9   : > { %v1333_v7 = vadd.f32 %v1332_v5, %v1331_v53  ;;  %v1319_v27 = vmul.f32 %v2882_v13, %v2882_v13 }
 0x2ea   : > { %v1326_v25 = vmul.f32 %v1318_v16, %v1292_v38  ;;  %v1336_v22 = vsel %vm733_vm1, %v1325_v15, 0.0 }
 0x2eb   : > { %v1335_v30 = vadd.f32 %v1334_v12, %v1333_v7  ;;  %v1327_v54 = vmul.f32 %v1319_v27, %v1294_v51 }
 0x2ec   : > { %v1338_v17 = vsel %vm733_vm1, %v1326_v25, 0.0 }
 0x2ed   : > { %v1337_v32 = vadd.f32 %v1336_v22, %v1335_v30  ;;  %v1340_v23 = vsel %vm733_vm1, %v1327_v54, 0.0 }
 0x2ef   : > { %v1339_v29 = vadd.f32 %v1338_v17, %v1337_v32 }
 0x2f1   : > { %v1341_v59 = vadd.f32 %v1340_v23, %v1339_v29 }
 0x347   : > { %v1296_v8 = vpop.xlane.xlu1 %1295 }
 0x348   : > { %v1304_v11 = vmax.f32 %v1296_v8, 1e-24 }
 0x34a   : > { %1941 = vrsqrt.f32 %v1304_v11 }
 0x357   : > { %v2888_v34 = vpop.eup %1941 }
 0x358   : > { %v1320_v42 = vmul.f32 %v2888_v34, %v2888_v34 }
 0x35a   : > { %v1328_v52 = vmul.f32 %v1320_v42, %v1296_v8 }
 0x35c   : > { %v1342_v38 = vsel %vm733_vm1, %v1328_v52, 0.0 }
 0x35d   : > { %v1343_v45 = vadd.f32 %v1342_v38, %v1341_v59 }
 0x35f   : > { %1344 = vadd.xlane.f32.xlu1 %v1343_v45 }
 0x364   : > { %v750_v35 = vpop.xlane.xlu0 %749 }
 0x365   : > { %v751_v60 = vrot.slane %v750_v35, 4 }
 0x367   : > { %v752_v61 = vadd.f32 %v751_v60, %v750_v35 }
 0x369   : > { %v753_v51 = vrot.slane %v752_v61, 2 }
 0x36b   : > { %v754_v24 = vadd.f32 %v753_v51, %v752_v61 }
 0x36d   : > { %v755_v43 = vrot.slane %v754_v24, 1 }
 0x36f   : > { %v756_v47 = vadd.f32 %v755_v43, %v754_v24 }
 0x371   : > { %1821 = vpush %v756_v47 }
 0x3a2   : > { %s1822_s25 = spop %1821 }
 0x3a3   : > { %s758_s27 = smax.f32 %s2009_s26, %s1822_s25  ;;  %s1953_s25 = scalar_lea.vmem %s1952_s24, 4096 }
 0x3a4   : > { %v759_v56 = vstv %s758_s27  ;;  %p1955_p1 = scmp.lt.s32.totalorder %s1953_s25, %s1947_s19 }
 0x3a5   : > { %1943 = vrsqrt.f32 %v759_v56 }
 0x3a6   : > { %p1956_p2 = por %p1955_p1, %p1954_p0 }
 0x3a8   : > { %p1957_p3 = pnand %p1956_p2, %p1950_p13 }
 0x3b2   : > { %v1944_v53 = vpop.eup %1943 }
 0x3b3   : > { %1823 = vpush %v1944_v53 }
 0x3e4   : > { %s1824_s30 = spop %1823 }
 0x3e5   : > { %v762_v8 = vstv %s1824_s30 }
 0x3e6   : > { %v763_v10 = vmul.f32 %v2816_v37, %v762_v8  ;;  %v764_v11 = vmul.f32 %v2814_v21, %v762_v8  ;;  %v765_v5 = vmul.f32 %v2822_v44, %v762_v8  ;;  %v766_v6 = vmul.f32 %v2827_v58, %v762_v8 }
 0x3e7   : > { %v767_v7 = vmul.f32 %v2829_v40, %v762_v8  ;;  %v768_v12 = vmul.f32 %v2837_v49, %v762_v8  ;;  %v769_v16 = vmul.f32 %v2839_v46, %v762_v8  ;;  %v770_v15 = vmul.f32 %v2847_v9, %v762_v8 }
 0x3e8   : > { %v771_v30 = vmul.f32 %v763_v10, %v2730_v39  ;;  %v772_v25 = vmul.f32 %v764_v11, %v2725_v0  ;;  %v773_v37 = vmul.f32 %v765_v5, %v2742_v14  ;;  %v774_v21 = vmul.f32 %v766_v6, %v2750_v20  ;;  %v1345_v22 = vpop.xlane.xlu1 %1344 }
 0x3e9   : > { %v775_v44 = vmul.f32 %v767_v7, %v2756_v36  ;;  %v776_v58 = vmul.f32 %v768_v12, %v2763_v33  ;;  %v777_v40 = vmul.f32 %v769_v16, %v2770_v50  ;;  %v778_v49 = vmul.f32 %v770_v15, %v2774_v57 }
 0x3ea   : > { %779 = vst [vmem:[%s2914_s4] sm:$0xff] %v771_v30  ;;  %780 = vst [vmem:[%s2914_s4 + $0x8] sm:$0xff] %v772_v25  ;;  %v1346_v0 = vrot.slane %v1345_v22, 4 }
 0x3eb   : > { %781 = vst [vmem:[%s2914_s4 + $0x10] sm:$0xff] %v773_v37  ;;  %782 = vst [vmem:[%s2914_s4 + $0x18] sm:$0xff] %v774_v21 }
 0x3ec   : > { %783 = vst [vmem:[%s2914_s4 + $0x20] sm:$0xff] %v775_v44  ;;  %784 = vst [vmem:[%s2914_s4 + $0x28] sm:$0xff] %v776_v58  ;;  %v1347_v39 = vadd.f32 %v1346_v0, %v1345_v22 }
 0x3ed   : > { %785 = vst [vmem:[%s2914_s4 + $0x30] sm:$0xff] %v777_v40  ;;  %786 = vst [vmem:[%s2914_s4 + $0x38] sm:$0xff] %v778_v49 }
 0x3ee   : > { %v1348_v14 = vrot.slane %v1347_v39, 2 }
 0x3f0   : > { %v1349_v20 = vadd.f32 %v1348_v14, %v1347_v39 }
 0x3f2   : > { %v1350_v36 = vrot.slane %v1349_v20, 1 }
 0x3f4   : > { %v1351_v33 = vadd.f32 %v1350_v36, %v1349_v20 }
 0x3f6   : > { %1825 = vpush %v1351_v33 }
 0x427   : > { %s1826_s5 = spop %1825 }
 0x428   : > { %s1353_s6 = smax.f32 %s2009_s26, %s1826_s5 }
 0x429   : > { %v1354_v50 = vstv %s1353_s6 }
 0x42a   : > { %1945 = vrsqrt.f32 %v1354_v50 }
 0x437   : > { %v1946_v57 = vpop.eup %1945 }
 0x438   : > { %1827 = vpush %v1946_v57 }
 0x469   : > { %s1828_s7 = spop %1827 }
 0x46a   : > { %v1357_v46 = vstv %s1828_s7 }
 0x46b   : > { %v1358_v9 = vmul.f32 %v2856_v26, %v1357_v46  ;;  %v1359_v27 = vmul.f32 %v2854_v48, %v1357_v46  ;;  %v1360_v32 = vmul.f32 %v2862_v28, %v1357_v46  ;;  %v1361_v17 = vmul.f32 %v2864_v31, %v1357_v46 }
 0x46c   : > { %v1362_v54 = vmul.f32 %v2872_v62, %v1357_v46  ;;  %v1363_v29 = vmul.f32 %v2874_v4, %v1357_v46  ;;  %v1364_v42 = vmul.f32 %v2882_v13, %v1357_v46  ;;  %v1365_v23 = vmul.f32 %v2888_v34, %v1357_v46 }
 0x46d   : > { %v1366_v48 = vmul.f32 %v1358_v9, %v2772_v55  ;;  %v1367_v26 = vmul.f32 %v1359_v27, %v2781_v41  ;;  %v1368_v28 = vmul.f32 %v1360_v32, %v2783_v1  ;;  %v1369_v31 = vmul.f32 %v1361_v17, %v2789_v3 }
 0x46e   : > { %v1370_v55 = vmul.f32 %v1362_v54, %v2791_v63  ;;  %v1371_v41 = vmul.f32 %v1363_v29, %v2797_v19  ;;  %v1372_v62 = vmul.f32 %v1364_v42, %v2799_v2  ;;  %v1373_v1 = vmul.f32 %v1365_v23, %v2810_v18 }
 0x46f   : > { %1532 = vst [vmem:[%s2914_s4 + $0x40] sm:$0xff] %v1366_v48  ;;  %1533 = vst [vmem:[%s2914_s4 + $0x48] sm:$0xff] %v1367_v26 }
 0x470   : > { %1534 = vst [vmem:[%s2914_s4 + $0x50] sm:$0xff] %v1368_v28  ;;  %1535 = vst [vmem:[%s2914_s4 + $0x58] sm:$0xff] %v1369_v31 }
 0x471   : > { %1536 = vst [vmem:[%s2914_s4 + $0x60] sm:$0xff] %v1370_v55  ;;  %1537 = vst [vmem:[%s2914_s4 + $0x68] sm:$0xff] %v1371_v41 }
 0x472   : > { %1538 = vst [vmem:[%s2914_s4 + $0x70] sm:$0xff] %v1372_v62  ;;  %1539 = vst [vmem:[%s2914_s4 + $0x78] sm:$0xff] %v1373_v1 }
 0x473   : > { %1960 = shalt.err (!%p1957_p3)
}
 0x474   : > { %s1961_s26 = scalar_lea.hbm %s2942_s11, 2048  ;;  %s1965_s29 = scalar_lea.hbm %s3003_s3, 4096 }
 0x475   : > { %p1962_p4 = scmp.ne.s32.totalorder %s2942_s11, %s1961_s26  ;;  %p1966_p9 = scmp.lt.s32.totalorder %s2942_s11, %s3003_s3 }
 0x476   : > { %p1967_p10 = scmp.lt.s32.totalorder %s1965_s29, %s1961_s26 }
 0x477   : > { %p1963_p7 = pnand %p1962_p4, %p2071_p5 }
 0x478   : > { %p1968_p11 = por %p1967_p10, %p1966_p9 }
 0x479   : > { %p1964_p8 = pneg %p1963_p7 }
 0x47b   : > { %p1969_p12 = pnand %p1968_p11, %p1964_p8 }
 0x47d   : > { %1972 = shalt.err (!%p1969_p12)
}
 0x47e   : > { %s2011_s5 = smov 128   ;;  %s2012_s6 = smov 8  }
 0x47f   : > { %1829 = dma.vmem_to_hbm [thread:$0]  (%p2071_p5), %s2944_s9, 2048, %s2942_s11, %s2960_s17, %s2011_s5, %s2011_s5, %s2012_s6  }
 0x480 PF: > { %p1835_p13 = scmp.ge.s32.totalorder %s2007_s15, 2  ;;  %s1413_s7 = sand.u32 1, %s1995_s12  }
 0x481   : > { %s1414_s8 = scalar_lea.sflag [#allocation3], %s1413_s7 }
 0x482   : > { %p1832_p0 = pnand %p1835_p13, %p2075_p6 }
 0x484   : > { %p1833_p1 = pneg %p1832_p0 }
 0x486   : > { %1990 = dma.done.wait (%p1833_p1), %s1414_s8, 2048  }
 0x487   : > { %1992 = vsyncadd (%p1833_p1), %s1414_s8, 4294965248  ;;  %p13_p2 = scmp.ge.s32.totalorder %s2058_s18, 4   ;;  %s3006_s12 = smov %s1999_s13 }
 0x488   : > { %s3007_s13 = smov %s2003_s14  ;;  %s3008_s14 = smov %s2069_s21 }
 0x489   : > { %s3009_s15 = smov %s2058_s18  ;;  %15 = sbr.rel (!%p13_p2) target bundleno = 3 (0x3), region = 69 }
 0x48e   :  { %1419 = vsyncpa [#allocation3], 1 }
 0x48f   :  { %1421 = vsyncpa [#allocation3 + $0x1], 1 }

</bundles_post_ra>
